<compile_context>
chip_gen: v5e
topology: v5e:2x2
jax: 0.10.0
libtpu: 0.0.40
codegen_flags: <defaults>
</compile_context>

<pallas_src>
import jax
import jax.numpy as jnp
from jax.experimental import pallas as pl
from jax.experimental.pallas import tpu as pltpu

# ---- small config, structurally matching the CLIP text encoder ----
VOCAB, MAX_POS = 128, 16
D, H, FF, L = 64, 4, 256, 2          # hidden, heads, mlp dim, layers
HD = D // H
PROJ = 64                            # CLIP text_projection output dim (== D here)
OUT = 512                            # nn.Linear(text_model_dim, 512)
LN_EPS = 1e-5
NEG = -1e9


def _ln(x, g, b):
    mu = jnp.mean(x, axis=-1, keepdims=True)
    var = jnp.mean((x - mu) ** 2, axis=-1, keepdims=True)
    return (x - mu) * jax.lax.rsqrt(var + LN_EPS) * g + b


# -------------------- fully fused forward kernel --------------------
def _fused_kernel(eos_ref,                      # SMEM (B,) int32 (scalar prefetch)
                  x_ref, mask_ref,              # (1,S,D) f32, (1,1,S) f32
                  vecs_ref,                     # (L,6,D) f32: ln1_g, ln1_b, ln2_g, ln2_b, bo, b2
                  wqkv_ref, bqkv_ref,           # (L,D,3D) bf16, (L,1,3D) f32
                  wo_ref,                       # (L,D,D) bf16
                  w1_ref, b1_ref, w2_ref,       # (L,D,FF) bf16, (L,1,FF) f32, (L,FF,D) bf16
                  lnf_ref,                      # (2,D) f32: [gamma; beta]
                  wp_ref, wl_ref, bl_ref,       # (D,PROJ) bf16, (PROJ,OUT) bf16, (1,OUT) f32
                  o_ref):                       # (1,1,OUT) f32
    b = pl.program_id(0)
    _, S, Dm = x_ref.shape
    bf16 = jnp.bfloat16

    x = x_ref[0]                                               # (S, D) f32, resident for all layers

    # additive attention bias: causal + key padding, built in-kernel
    row = jax.lax.broadcasted_iota(jnp.int32, (S, S), 0)
    col = jax.lax.broadcasted_iota(jnp.int32, (S, S), 1)
    bias = jnp.where(col > row, NEG, 0.0).astype(jnp.float32)
    bias = bias + (1.0 - mask_ref[0]) * NEG                    # (S,S) + (1,S) -> (S,S)

    scale = HD ** -0.5
    for li in range(L):                                        # static unroll over layers
        vecs = vecs_ref[li]                                    # (6, D) f32
        ln1_g, ln1_b = vecs[0:1], vecs[1:2]
        ln2_g, ln2_b = vecs[2:3], vecs[3:4]
        bo, b2 = vecs[4:5], vecs[5:6]
        wo = wo_ref[li]                                        # (D, D) bf16

        # ---- self-attention (pre-LN), fused QKV projection ----
        h = _ln(x, ln1_g, ln1_b)
        qkv = jnp.dot(h.astype(bf16), wqkv_ref[li],
                      preferred_element_type=jnp.float32) + bqkv_ref[li]   # (S, 3D)
        q = qkv[:, 0:Dm] * scale
        k = qkv[:, Dm:2 * Dm]
        v = qkv[:, 2 * Dm:3 * Dm]

        attn = jnp.zeros((S, Dm), jnp.float32)
        for hh in range(H):                                    # static loop over heads
            sl = slice(hh * HD, (hh + 1) * HD)
            s = jnp.einsum('qd,kd->qk',
                           q[:, sl].astype(bf16), k[:, sl].astype(bf16),
                           preferred_element_type=jnp.float32) + bias      # (S, S)
            p = jax.nn.softmax(s, axis=-1)
            head = jnp.dot(p.astype(bf16), v[:, sl].astype(bf16),
                           preferred_element_type=jnp.float32)             # (S, HD)
            # fold this head straight into the output projection: no lane-axis concat
            attn = attn + jnp.dot(head.astype(bf16), wo[sl, :],
                                  preferred_element_type=jnp.float32)
        x = x + attn + bo

        # ---- MLP (quick_gelu) ----
        h2 = _ln(x, ln2_g, ln2_b)
        f = jnp.dot(h2.astype(bf16), w1_ref[li],
                    preferred_element_type=jnp.float32) + b1_ref[li]
        f = f * jax.nn.sigmoid(1.702 * f)
        f = jnp.dot(f.astype(bf16), w2_ref[li],
                    preferred_element_type=jnp.float32) + b2
        x = x + f

    # ---- pool the EOS row first, then final LN + text_projection + head on (1, D) ----
    eos = eos_ref[b]
    sel = (jax.lax.broadcasted_iota(jnp.int32, (S, 1), 0) == eos).astype(jnp.float32)
    pooled = jnp.sum(x * sel, axis=0, keepdims=True)           # (1, D)
    lnf = lnf_ref[...]
    pooled = _ln(pooled, lnf[0:1], lnf[1:2])
    t = jnp.dot(pooled.astype(bf16), wp_ref[...], preferred_element_type=jnp.float32)
    o_ref[0] = jnp.dot(t.astype(bf16), wl_ref[...],
                       preferred_element_type=jnp.float32) + bl_ref[...]


# -------------------- wrapper (embedding gather + eos lookup are JAX glue) --------------------
def text_encoder_clip(params, input_ids, attention_mask):
    B, S = input_ids.shape
    # token + position embeddings (gather stays in XLA)
    x = jnp.take(params['tok_emb'], input_ids, axis=0) + params['pos_emb'][:S][None]
    mask = attention_mask.astype(jnp.float32)[:, None, :]            # (B, 1, S)
    # CLIP pooling position: EOS token (max id in this toy tokenizer)
    # TODO(synk): with the real CLIP tokenizer, locate eos_token_id explicitly.
    eos_idx = jnp.argmax(input_ids, axis=-1).astype(jnp.int32)       # (B,)

    weights = [params['vecs_d'], params['wqkv'], params['bqkv'], params['wo'],
               params['w1'], params['b1'], params['w2'],
               params['lnf'], params['w_proj'], params['w_lin'], params['b_lin']]

    in_specs = [pl.BlockSpec((1, S, D), lambda b, eos: (b, 0, 0)),
                pl.BlockSpec((1, 1, S), lambda b, eos: (b, 0, 0))]
    for w in weights:   # weights are whole-array blocks, shared (not re-DMA'd) across the grid
        in_specs.append(pl.BlockSpec(w.shape, lambda b, eos, nd=w.ndim: (0,) * nd))

    out = pl.pallas_call(
        _fused_kernel,
        out_shape=jax.ShapeDtypeStruct((B, 1, OUT), jnp.float32),
        grid_spec=pltpu.PrefetchScalarGridSpec(
            num_scalar_prefetch=1,
            grid=(B,),
            in_specs=in_specs,
            out_specs=pl.BlockSpec((1, 1, OUT), lambda b, eos: (b, 0, 0)),
        ),
        compiler_params=pltpu.CompilerParams(dimension_semantics=("parallel",)),
    )(eos_idx, x, mask, *weights)
    return out[:, 0, :]


# -------------------- deterministic parameter init (packed layout) --------------------
def init_params(key):
    keys = iter(jax.random.split(key, 64))

    def nrm(shape, std=0.02):
        return std * jax.random.normal(next(keys), shape, jnp.float32)

    wqkv, wo, w1, w2, vecs = [], [], [], [], []
    ones = jnp.ones((D,), jnp.float32)
    zeros = jnp.zeros((D,), jnp.float32)
    for _ in range(L):
        wq, wk, wv = nrm((D, D)), nrm((D, D)), nrm((D, D))
        wqkv.append(jnp.concatenate([wq, wk, wv], axis=1))            # (D, 3D)
        wo.append(nrm((D, D)))
        w1.append(nrm((D, FF)))
        w2.append(nrm((FF, D)))
        # packed D-wide vectors: ln1_g, ln1_b, ln2_g, ln2_b, bo, b2
        vecs.append(jnp.stack([ones, zeros, ones, zeros, zeros, zeros]))

    return dict(
        tok_emb=nrm((VOCAB, D)),
        pos_emb=nrm((MAX_POS, D)),
        vecs_d=jnp.stack(vecs).astype(jnp.float32),                   # (L, 6, D)
        wqkv=jnp.stack(wqkv).astype(jnp.bfloat16),                    # (L, D, 3D)
        bqkv=jnp.zeros((L, 1, 3 * D), jnp.float32),
        wo=jnp.stack(wo).astype(jnp.bfloat16),                        # (L, D, D)
        w1=jnp.stack(w1).astype(jnp.bfloat16),                        # (L, D, FF)
        b1=jnp.zeros((L, 1, FF), jnp.float32),
        w2=jnp.stack(w2).astype(jnp.bfloat16),                        # (L, FF, D)
        lnf=jnp.stack([ones, zeros]),                                 # (2, D)
        w_proj=nrm((D, PROJ)).astype(jnp.bfloat16),                   # CLIP text_projection (no bias)
        w_lin=nrm((PROJ, OUT)).astype(jnp.bfloat16),                  # self.linear
        b_lin=jnp.zeros((1, OUT), jnp.float32),
    )


if __name__ == "__main__":
    key = jax.random.PRNGKey(0)
    pkey, ikey = jax.random.split(key)
    params = init_params(pkey)

    B, S = 2, 8
    lengths = jnp.array([8, 6], jnp.int32)
    pos = jnp.arange(S)[None, :]
    attention_mask = (pos < lengths[:, None]).astype(jnp.int32)
    input_ids = jax.random.randint(ikey, (B, S), 1, VOCAB - 1, jnp.int32)
    input_ids = jnp.where(pos == (lengths[:, None] - 1), VOCAB - 1, input_ids)  # EOS = max id
    input_ids = jnp.where(attention_mask == 0, 0, input_ids)                    # pad id

    out = text_encoder_clip(params, input_ids, attention_mask)
    out = jax.block_until_ready(out)
    assert out.shape == (B, OUT) and out.dtype == jnp.float32
    print("KERNEL_OK")
</pallas_src>

<mosaic_0001>
module attributes {stable_mosaic.version = 11 : i64} {
  func.func @_fused_kernel(%arg0: i32, %arg1: memref<2xi32, #tpu.memory_space<smem>>, %arg2: memref<1x8x64xf32, #tpu.memory_space<vmem>>, %arg3: memref<1x1x8xf32, #tpu.memory_space<vmem>>, %arg4: memref<2x6x64xf32, #tpu.memory_space<vmem>>, %arg5: memref<2x64x192xbf16, #tpu.memory_space<vmem>>, %arg6: memref<2x1x192xf32, #tpu.memory_space<vmem>>, %arg7: memref<2x64x64xbf16, #tpu.memory_space<vmem>>, %arg8: memref<2x64x256xbf16, #tpu.memory_space<vmem>>, %arg9: memref<2x1x256xf32, #tpu.memory_space<vmem>>, %arg10: memref<2x256x64xbf16, #tpu.memory_space<vmem>>, %arg11: memref<2x64xf32, #tpu.memory_space<vmem>>, %arg12: memref<64x64xbf16, #tpu.memory_space<vmem>>, %arg13: memref<64x512xbf16, #tpu.memory_space<vmem>>, %arg14: memref<1x512xf32, #tpu.memory_space<vmem>>, %arg15: memref<1x1x512xf32, #tpu.memory_space<vmem>>) attributes {dimension_semantics = [#tpu.dimension_semantics<parallel>], iteration_bounds = array<i64: 2>, scalar_prefetch = 1 : i64, scratch_operands = 0 : i64, tpu.core_type = #tpu.core_type<tc>, window_params = [{transform_indices = @transform_0, window_bounds = array<i64: 1, 8, 64>}, {transform_indices = @transform_1, window_bounds = array<i64: 1, 1, 8>}, {pipeline_mode = #tpu.pipeline_mode<synchronous>, transform_indices = @transform_2, window_bounds = array<i64: 2, 6, 64>}, {pipeline_mode = #tpu.pipeline_mode<synchronous>, transform_indices = @transform_3, window_bounds = array<i64: 2, 64, 192>}, {pipeline_mode = #tpu.pipeline_mode<synchronous>, transform_indices = @transform_4, window_bounds = array<i64: 2, 1, 192>}, {pipeline_mode = #tpu.pipeline_mode<synchronous>, transform_indices = @transform_5, window_bounds = array<i64: 2, 64, 64>}, {pipeline_mode = #tpu.pipeline_mode<synchronous>, transform_indices = @transform_6, window_bounds = array<i64: 2, 64, 256>}, {pipeline_mode = #tpu.pipeline_mode<synchronous>, transform_indices = @transform_7, window_bounds = array<i64: 2, 1, 256>}, {pipeline_mode = #tpu.pipeline_mode<synchronous>, transform_indices = @transform_8, window_bounds = array<i64: 2, 256, 64>}, {pipeline_mode = #tpu.pipeline_mode<synchronous>, transform_indices = @transform_9, window_bounds = array<i64: 2, 64>}, {pipeline_mode = #tpu.pipeline_mode<synchronous>, transform_indices = @transform_10, window_bounds = array<i64: 64, 64>}, {pipeline_mode = #tpu.pipeline_mode<synchronous>, transform_indices = @transform_11, window_bounds = array<i64: 64, 512>}, {pipeline_mode = #tpu.pipeline_mode<synchronous>, transform_indices = @transform_12, window_bounds = array<i64: 1, 512>}, {transform_indices = @transform_13, window_bounds = array<i64: 1, 1, 512>}]} {
    %c0 = arith.constant 0 : index
    %c0_0 = arith.constant 0 : index
    %c0_1 = arith.constant 0 : index
    %0 = vector.load %arg2[%c0, %c0_0, %c0_1] : memref<1x8x64xf32, #tpu.memory_space<vmem>>, vector<1x8x64xf32>
    %1 = vector.shape_cast %0 : vector<1x8x64xf32> to vector<8x64xf32>
    %2 = tpu.iota {dimensions = array<i32: 0>} : vector<8x8xi32>
    %3 = tpu.iota {dimensions = array<i32: 1>} : vector<8x8xi32>
    %4 = arith.cmpi sgt, %3, %2 : vector<8x8xi32>
    %cst = arith.constant -1.000000e+09 : f32
    %cst_2 = arith.constant 0.000000e+00 : f32
    %5 = vector.broadcast %cst : f32 to vector<8x8xf32>
    %6 = vector.broadcast %cst_2 : f32 to vector<8x8xf32>
    %7 = arith.select %4, %5, %6 : vector<8x8xi1>, vector<8x8xf32>
    %c0_3 = arith.constant 0 : index
    %c0_4 = arith.constant 0 : index
    %c0_5 = arith.constant 0 : index
    %8 = vector.load %arg3[%c0_3, %c0_4, %c0_5] : memref<1x1x8xf32, #tpu.memory_space<vmem>>, vector<1x1x8xf32>
    %9 = vector.shape_cast %8 : vector<1x1x8xf32> to vector<1x8xf32>
    %cst_6 = arith.constant 1.000000e+00 : f32
    %10 = vector.broadcast %cst_6 : f32 to vector<1x8xf32>
    %11 = arith.subf %10, %9 : vector<1x8xf32>
    %cst_7 = arith.constant -1.000000e+09 : f32
    %12 = vector.broadcast %cst_7 : f32 to vector<1x8xf32>
    %13 = arith.mulf %11, %12 : vector<1x8xf32>
    %14 = vector.broadcast %13 : vector<1x8xf32> to vector<8x8xf32>
    %15 = arith.addf %7, %14 : vector<8x8xf32>
    %c0_8 = arith.constant 0 : index
    %c0_9 = arith.constant 0 : index
    %c0_10 = arith.constant 0 : index
    %16 = vector.load %arg4[%c0_8, %c0_9, %c0_10] : memref<2x6x64xf32, #tpu.memory_space<vmem>>, vector<1x6x64xf32>
    %17 = vector.shape_cast %16 : vector<1x6x64xf32> to vector<6x64xf32>
    %18 = vector.extract_strided_slice %17 {offsets = [0, 0], sizes = [1, 64], strides = [1, 1]} : vector<6x64xf32> to vector<1x64xf32>
    %19 = vector.extract_strided_slice %17 {offsets = [1, 0], sizes = [1, 64], strides = [1, 1]} : vector<6x64xf32> to vector<1x64xf32>
    %20 = vector.extract_strided_slice %17 {offsets = [2, 0], sizes = [1, 64], strides = [1, 1]} : vector<6x64xf32> to vector<1x64xf32>
    %21 = vector.extract_strided_slice %17 {offsets = [3, 0], sizes = [1, 64], strides = [1, 1]} : vector<6x64xf32> to vector<1x64xf32>
    %22 = vector.extract_strided_slice %17 {offsets = [4, 0], sizes = [1, 64], strides = [1, 1]} : vector<6x64xf32> to vector<1x64xf32>
    %23 = vector.extract_strided_slice %17 {offsets = [5, 0], sizes = [1, 64], strides = [1, 1]} : vector<6x64xf32> to vector<1x64xf32>
    %c0_11 = arith.constant 0 : index
    %c0_12 = arith.constant 0 : index
    %c0_13 = arith.constant 0 : index
    %24 = vector.load %arg7[%c0_11, %c0_12, %c0_13] : memref<2x64x64xbf16, #tpu.memory_space<vmem>>, vector<1x64x64xbf16>
    %25 = vector.shape_cast %24 : vector<1x64x64xbf16> to vector<64x64xbf16>
    %cst_14 = arith.constant dense<0.000000e+00> : vector<8xf32>
    %26 = vector.multi_reduction <add>, %1, %cst_14 [1] : vector<8x64xf32> to vector<8xf32>
    %27 = vector.shape_cast %26 : vector<8xf32> to vector<8x1xf32>
    %cst_15 = arith.constant 6.400000e+01 : f32
    %28 = vector.broadcast %cst_15 : f32 to vector<8x1xf32>
    %29 = arith.divf %27, %28 : vector<8x1xf32>
    %30 = vector.broadcast %29 : vector<8x1xf32> to vector<8x64xf32>
    %31 = arith.subf %1, %30 : vector<8x64xf32>
    %32 = arith.mulf %31, %31 : vector<8x64xf32>
    %cst_16 = arith.constant dense<0.000000e+00> : vector<8xf32>
    %33 = vector.multi_reduction <add>, %32, %cst_16 [1] : vector<8x64xf32> to vector<8xf32>
    %34 = vector.shape_cast %33 : vector<8xf32> to vector<8x1xf32>
    %cst_17 = arith.constant 6.400000e+01 : f32
    %35 = vector.broadcast %cst_17 : f32 to vector<8x1xf32>
    %36 = arith.divf %34, %35 : vector<8x1xf32>
    %37 = vector.broadcast %29 : vector<8x1xf32> to vector<8x64xf32>
    %38 = arith.subf %1, %37 : vector<8x64xf32>
    %cst_18 = arith.constant 9.99999974E-6 : f32
    %39 = vector.broadcast %cst_18 : f32 to vector<8x1xf32>
    %40 = arith.addf %36, %39 : vector<8x1xf32>
    %41 = math.rsqrt %40 : vector<8x1xf32>
    %42 = vector.broadcast %41 : vector<8x1xf32> to vector<8x64xf32>
    %43 = arith.mulf %38, %42 : vector<8x64xf32>
    %44 = vector.broadcast %18 : vector<1x64xf32> to vector<8x64xf32>
    %45 = arith.mulf %43, %44 : vector<8x64xf32>
    %46 = vector.broadcast %19 : vector<1x64xf32> to vector<8x64xf32>
    %47 = arith.addf %45, %46 : vector<8x64xf32>
    %48 = arith.truncf %47 : vector<8x64xf32> to vector<8x64xbf16>
    %c0_19 = arith.constant 0 : index
    %c0_20 = arith.constant 0 : index
    %c0_21 = arith.constant 0 : index
    %49 = vector.load %arg5[%c0_19, %c0_20, %c0_21] : memref<2x64x192xbf16, #tpu.memory_space<vmem>>, vector<1x64x192xbf16>
    %50 = vector.shape_cast %49 : vector<1x64x192xbf16> to vector<64x192xbf16>
    %cst_22 = arith.constant dense<0.000000e+00> : vector<8x192xf32>
    %51 = tpu.matmul %48, %50, %cst_22 {dimension_numbers = #tpu.dot_dimension_numbers<[1], [0], [0], [1], [0, 0, 1, 1], [], []>} : vector<8x64xbf16>, vector<64x192xbf16>, vector<8x192xf32> -> vector<8x192xf32>
    %c0_23 = arith.constant 0 : index
    %c0_24 = arith.constant 0 : index
    %c0_25 = arith.constant 0 : index
    %52 = vector.load %arg6[%c0_23, %c0_24, %c0_25] : memref<2x1x192xf32, #tpu.memory_space<vmem>>, vector<1x1x192xf32>
    %53 = vector.shape_cast %52 : vector<1x1x192xf32> to vector<1x192xf32>
    %54 = vector.broadcast %53 : vector<1x192xf32> to vector<8x192xf32>
    %55 = arith.addf %51, %54 : vector<8x192xf32>
    %56 = vector.extract_strided_slice %55 {offsets = [0, 0], sizes = [8, 64], strides = [1, 1]} : vector<8x192xf32> to vector<8x64xf32>
    %cst_26 = arith.constant 2.500000e-01 : f32
    %57 = vector.broadcast %cst_26 : f32 to vector<8x64xf32>
    %58 = arith.mulf %56, %57 : vector<8x64xf32>
    %59 = vector.extract_strided_slice %55 {offsets = [0, 64], sizes = [8, 64], strides = [1, 1]} : vector<8x192xf32> to vector<8x64xf32>
    %60 = vector.extract_strided_slice %55 {offsets = [0, 128], sizes = [8, 64], strides = [1, 1]} : vector<8x192xf32> to vector<8x64xf32>
    %cst_27 = arith.constant 0.000000e+00 : f32
    %61 = vector.broadcast %cst_27 : f32 to vector<8x64xf32>
    %62 = vector.extract_strided_slice %58 {offsets = [0, 0], sizes = [8, 16], strides = [1, 1]} : vector<8x64xf32> to vector<8x16xf32>
    %63 = arith.truncf %62 : vector<8x16xf32> to vector<8x16xbf16>
    %64 = vector.extract_strided_slice %59 {offsets = [0, 0], sizes = [8, 16], strides = [1, 1]} : vector<8x64xf32> to vector<8x16xf32>
    %65 = arith.truncf %64 : vector<8x16xf32> to vector<8x16xbf16>
    "tpu.trace_start"() <{level = 10 : i32, message = "qd,kd->qk"}> : () -> ()
    %cst_28 = arith.constant dense<0.000000e+00> : vector<8x8xf32>
    %66 = tpu.matmul %63, %65, %cst_28 {dimension_numbers = #tpu.dot_dimension_numbers<[1], [1], [0], [0], [0, 0, 1, 0], [], []>} : vector<8x16xbf16>, vector<8x16xbf16>, vector<8x8xf32> -> vector<8x8xf32>
    "tpu.trace_stop"() : () -> ()
    %67 = arith.addf %66, %15 : vector<8x8xf32>
    %cst_29 = arith.constant dense<0xFF800000> : vector<8xf32>
    %68 = vector.multi_reduction <maximumf>, %67, %cst_29 [1] : vector<8x8xf32> to vector<8xf32>
    %cst_30 = arith.constant 0xFF800000 : f32
    %69 = vector.broadcast %cst_30 : f32 to vector<8xf32>
    %70 = arith.maximumf %69, %68 : vector<8xf32>
    %71 = vector.shape_cast %70 : vector<8xf32> to vector<8x1xf32>
    %72 = vector.broadcast %71 : vector<8x1xf32> to vector<8x8xf32>
    %73 = arith.subf %67, %72 : vector<8x8xf32>
    %74 = math.exp %73 : vector<8x8xf32>
    %cst_31 = arith.constant dense<0.000000e+00> : vector<8xf32>
    %75 = vector.multi_reduction <add>, %74, %cst_31 [1] : vector<8x8xf32> to vector<8xf32>
    %76 = vector.shape_cast %75 : vector<8xf32> to vector<8x1xf32>
    %77 = vector.broadcast %76 : vector<8x1xf32> to vector<8x8xf32>
    %78 = arith.divf %74, %77 : vector<8x8xf32>
    %79 = arith.truncf %78 : vector<8x8xf32> to vector<8x8xbf16>
    %80 = vector.extract_strided_slice %60 {offsets = [0, 0], sizes = [8, 16], strides = [1, 1]} : vector<8x64xf32> to vector<8x16xf32>
    %81 = arith.truncf %80 : vector<8x16xf32> to vector<8x16xbf16>
    %cst_32 = arith.constant dense<0.000000e+00> : vector<8x16xf32>
    %82 = tpu.matmul %79, %81, %cst_32 {dimension_numbers = #tpu.dot_dimension_numbers<[1], [0], [0], [1], [0, 0, 1, 1], [], []>} : vector<8x8xbf16>, vector<8x16xbf16>, vector<8x16xf32> -> vector<8x16xf32>
    %83 = arith.truncf %82 : vector<8x16xf32> to vector<8x16xbf16>
    %84 = vector.extract_strided_slice %25 {offsets = [0, 0], sizes = [16, 64], strides = [1, 1]} : vector<64x64xbf16> to vector<16x64xbf16>
    %cst_33 = arith.constant dense<0.000000e+00> : vector<8x64xf32>
    %85 = tpu.matmul %83, %84, %cst_33 {dimension_numbers = #tpu.dot_dimension_numbers<[1], [0], [0], [1], [0, 0, 1, 1], [], []>} : vector<8x16xbf16>, vector<16x64xbf16>, vector<8x64xf32> -> vector<8x64xf32>
    %86 = arith.addf %61, %85 : vector<8x64xf32>
    %87 = vector.extract_strided_slice %58 {offsets = [0, 16], sizes = [8, 16], strides = [1, 1]} : vector<8x64xf32> to vector<8x16xf32>
    %88 = arith.truncf %87 : vector<8x16xf32> to vector<8x16xbf16>
    %89 = vector.extract_strided_slice %59 {offsets = [0, 16], sizes = [8, 16], strides = [1, 1]} : vector<8x64xf32> to vector<8x16xf32>
    %90 = arith.truncf %89 : vector<8x16xf32> to vector<8x16xbf16>
    "tpu.trace_start"() <{level = 10 : i32, message = "qd,kd->qk"}> : () -> ()
    %cst_34 = arith.constant dense<0.000000e+00> : vector<8x8xf32>
    %91 = tpu.matmul %88, %90, %cst_34 {dimension_numbers = #tpu.dot_dimension_numbers<[1], [1], [0], [0], [0, 0, 1, 0], [], []>} : vector<8x16xbf16>, vector<8x16xbf16>, vector<8x8xf32> -> vector<8x8xf32>
    "tpu.trace_stop"() : () -> ()
    %92 = arith.addf %91, %15 : vector<8x8xf32>
    %cst_35 = arith.constant dense<0xFF800000> : vector<8xf32>
    %93 = vector.multi_reduction <maximumf>, %92, %cst_35 [1] : vector<8x8xf32> to vector<8xf32>
    %cst_36 = arith.constant 0xFF800000 : f32
    %94 = vector.broadcast %cst_36 : f32 to vector<8xf32>
    %95 = arith.maximumf %94, %93 : vector<8xf32>
    %96 = vector.shape_cast %95 : vector<8xf32> to vector<8x1xf32>
    %97 = vector.broadcast %96 : vector<8x1xf32> to vector<8x8xf32>
    %98 = arith.subf %92, %97 : vector<8x8xf32>
    %99 = math.exp %98 : vector<8x8xf32>
    %cst_37 = arith.constant dense<0.000000e+00> : vector<8xf32>
    %100 = vector.multi_reduction <add>, %99, %cst_37 [1] : vector<8x8xf32> to vector<8xf32>
    %101 = vector.shape_cast %100 : vector<8xf32> to vector<8x1xf32>
    %102 = vector.broadcast %101 : vector<8x1xf32> to vector<8x8xf32>
    %103 = arith.divf %99, %102 : vector<8x8xf32>
    %104 = arith.truncf %103 : vector<8x8xf32> to vector<8x8xbf16>
    %105 = vector.extract_strided_slice %60 {offsets = [0, 16], sizes = [8, 16], strides = [1, 1]} : vector<8x64xf32> to vector<8x16xf32>
    %106 = arith.truncf %105 : vector<8x16xf32> to vector<8x16xbf16>
    %cst_38 = arith.constant dense<0.000000e+00> : vector<8x16xf32>
    %107 = tpu.matmul %104, %106, %cst_38 {dimension_numbers = #tpu.dot_dimension_numbers<[1], [0], [0], [1], [0, 0, 1, 1], [], []>} : vector<8x8xbf16>, vector<8x16xbf16>, vector<8x16xf32> -> vector<8x16xf32>
    %108 = arith.truncf %107 : vector<8x16xf32> to vector<8x16xbf16>
    %109 = vector.extract_strided_slice %25 {offsets = [16, 0], sizes = [16, 64], strides = [1, 1]} : vector<64x64xbf16> to vector<16x64xbf16>
    %cst_39 = arith.constant dense<0.000000e+00> : vector<8x64xf32>
    %110 = tpu.matmul %108, %109, %cst_39 {dimension_numbers = #tpu.dot_dimension_numbers<[1], [0], [0], [1], [0, 0, 1, 1], [], []>} : vector<8x16xbf16>, vector<16x64xbf16>, vector<8x64xf32> -> vector<8x64xf32>
    %111 = arith.addf %86, %110 : vector<8x64xf32>
    %112 = vector.extract_strided_slice %58 {offsets = [0, 32], sizes = [8, 16], strides = [1, 1]} : vector<8x64xf32> to vector<8x16xf32>
    %113 = arith.truncf %112 : vector<8x16xf32> to vector<8x16xbf16>
    %114 = vector.extract_strided_slice %59 {offsets = [0, 32], sizes = [8, 16], strides = [1, 1]} : vector<8x64xf32> to vector<8x16xf32>
    %115 = arith.truncf %114 : vector<8x16xf32> to vector<8x16xbf16>
    "tpu.trace_start"() <{level = 10 : i32, message = "qd,kd->qk"}> : () -> ()
    %cst_40 = arith.constant dense<0.000000e+00> : vector<8x8xf32>
    %116 = tpu.matmul %113, %115, %cst_40 {dimension_numbers = #tpu.dot_dimension_numbers<[1], [1], [0], [0], [0, 0, 1, 0], [], []>} : vector<8x16xbf16>, vector<8x16xbf16>, vector<8x8xf32> -> vector<8x8xf32>
    "tpu.trace_stop"() : () -> ()
    %117 = arith.addf %116, %15 : vector<8x8xf32>
    %cst_41 = arith.constant dense<0xFF800000> : vector<8xf32>
    %118 = vector.multi_reduction <maximumf>, %117, %cst_41 [1] : vector<8x8xf32> to vector<8xf32>
    %cst_42 = arith.constant 0xFF800000 : f32
    %119 = vector.broadcast %cst_42 : f32 to vector<8xf32>
    %120 = arith.maximumf %119, %118 : vector<8xf32>
    %121 = vector.shape_cast %120 : vector<8xf32> to vector<8x1xf32>
    %122 = vector.broadcast %121 : vector<8x1xf32> to vector<8x8xf32>
    %123 = arith.subf %117, %122 : vector<8x8xf32>
    %124 = math.exp %123 : vector<8x8xf32>
    %cst_43 = arith.constant dense<0.000000e+00> : vector<8xf32>
    %125 = vector.multi_reduction <add>, %124, %cst_43 [1] : vector<8x8xf32> to vector<8xf32>
    %126 = vector.shape_cast %125 : vector<8xf32> to vector<8x1xf32>
    %127 = vector.broadcast %126 : vector<8x1xf32> to vector<8x8xf32>
    %128 = arith.divf %124, %127 : vector<8x8xf32>
    %129 = arith.truncf %128 : vector<8x8xf32> to vector<8x8xbf16>
    %130 = vector.extract_strided_slice %60 {offsets = [0, 32], sizes = [8, 16], strides = [1, 1]} : vector<8x64xf32> to vector<8x16xf32>
    %131 = arith.truncf %130 : vector<8x16xf32> to vector<8x16xbf16>
    %cst_44 = arith.constant dense<0.000000e+00> : vector<8x16xf32>
    %132 = tpu.matmul %129, %131, %cst_44 {dimension_numbers = #tpu.dot_dimension_numbers<[1], [0], [0], [1], [0, 0, 1, 1], [], []>} : vector<8x8xbf16>, vector<8x16xbf16>, vector<8x16xf32> -> vector<8x16xf32>
    %133 = arith.truncf %132 : vector<8x16xf32> to vector<8x16xbf16>
    %134 = vector.extract_strided_slice %25 {offsets = [32, 0], sizes = [16, 64], strides = [1, 1]} : vector<64x64xbf16> to vector<16x64xbf16>
    %cst_45 = arith.constant dense<0.000000e+00> : vector<8x64xf32>
    %135 = tpu.matmul %133, %134, %cst_45 {dimension_numbers = #tpu.dot_dimension_numbers<[1], [0], [0], [1], [0, 0, 1, 1], [], []>} : vector<8x16xbf16>, vector<16x64xbf16>, vector<8x64xf32> -> vector<8x64xf32>
    %136 = arith.addf %111, %135 : vector<8x64xf32>
    %137 = vector.extract_strided_slice %58 {offsets = [0, 48], sizes = [8, 16], strides = [1, 1]} : vector<8x64xf32> to vector<8x16xf32>
    %138 = arith.truncf %137 : vector<8x16xf32> to vector<8x16xbf16>
    %139 = vector.extract_strided_slice %59 {offsets = [0, 48], sizes = [8, 16], strides = [1, 1]} : vector<8x64xf32> to vector<8x16xf32>
    %140 = arith.truncf %139 : vector<8x16xf32> to vector<8x16xbf16>
    "tpu.trace_start"() <{level = 10 : i32, message = "qd,kd->qk"}> : () -> ()
    %cst_46 = arith.constant dense<0.000000e+00> : vector<8x8xf32>
    %141 = tpu.matmul %138, %140, %cst_46 {dimension_numbers = #tpu.dot_dimension_numbers<[1], [1], [0], [0], [0, 0, 1, 0], [], []>} : vector<8x16xbf16>, vector<8x16xbf16>, vector<8x8xf32> -> vector<8x8xf32>
    "tpu.trace_stop"() : () -> ()
    %142 = arith.addf %141, %15 : vector<8x8xf32>
    %cst_47 = arith.constant dense<0xFF800000> : vector<8xf32>
    %143 = vector.multi_reduction <maximumf>, %142, %cst_47 [1] : vector<8x8xf32> to vector<8xf32>
    %cst_48 = arith.constant 0xFF800000 : f32
    %144 = vector.broadcast %cst_48 : f32 to vector<8xf32>
    %145 = arith.maximumf %144, %143 : vector<8xf32>
    %146 = vector.shape_cast %145 : vector<8xf32> to vector<8x1xf32>
    %147 = vector.broadcast %146 : vector<8x1xf32> to vector<8x8xf32>
    %148 = arith.subf %142, %147 : vector<8x8xf32>
    %149 = math.exp %148 : vector<8x8xf32>
    %cst_49 = arith.constant dense<0.000000e+00> : vector<8xf32>
    %150 = vector.multi_reduction <add>, %149, %cst_49 [1] : vector<8x8xf32> to vector<8xf32>
    %151 = vector.shape_cast %150 : vector<8xf32> to vector<8x1xf32>
    %152 = vector.broadcast %151 : vector<8x1xf32> to vector<8x8xf32>
    %153 = arith.divf %149, %152 : vector<8x8xf32>
    %154 = arith.truncf %153 : vector<8x8xf32> to vector<8x8xbf16>
    %155 = vector.extract_strided_slice %60 {offsets = [0, 48], sizes = [8, 16], strides = [1, 1]} : vector<8x64xf32> to vector<8x16xf32>
    %156 = arith.truncf %155 : vector<8x16xf32> to vector<8x16xbf16>
    %cst_50 = arith.constant dense<0.000000e+00> : vector<8x16xf32>
    %157 = tpu.matmul %154, %156, %cst_50 {dimension_numbers = #tpu.dot_dimension_numbers<[1], [0], [0], [1], [0, 0, 1, 1], [], []>} : vector<8x8xbf16>, vector<8x16xbf16>, vector<8x16xf32> -> vector<8x16xf32>
    %158 = arith.truncf %157 : vector<8x16xf32> to vector<8x16xbf16>
    %159 = vector.extract_strided_slice %25 {offsets = [48, 0], sizes = [16, 64], strides = [1, 1]} : vector<64x64xbf16> to vector<16x64xbf16>
    %cst_51 = arith.constant dense<0.000000e+00> : vector<8x64xf32>
    %160 = tpu.matmul %158, %159, %cst_51 {dimension_numbers = #tpu.dot_dimension_numbers<[1], [0], [0], [1], [0, 0, 1, 1], [], []>} : vector<8x16xbf16>, vector<16x64xbf16>, vector<8x64xf32> -> vector<8x64xf32>
    %161 = arith.addf %136, %160 : vector<8x64xf32>
    %162 = arith.addf %1, %161 : vector<8x64xf32>
    %163 = vector.broadcast %22 : vector<1x64xf32> to vector<8x64xf32>
    %164 = arith.addf %162, %163 : vector<8x64xf32>
    %cst_52 = arith.constant dense<0.000000e+00> : vector<8xf32>
    %165 = vector.multi_reduction <add>, %164, %cst_52 [1] : vector<8x64xf32> to vector<8xf32>
    %166 = vector.shape_cast %165 : vector<8xf32> to vector<8x1xf32>
    %cst_53 = arith.constant 6.400000e+01 : f32
    %167 = vector.broadcast %cst_53 : f32 to vector<8x1xf32>
    %168 = arith.divf %166, %167 : vector<8x1xf32>
    %169 = vector.broadcast %168 : vector<8x1xf32> to vector<8x64xf32>
    %170 = arith.subf %164, %169 : vector<8x64xf32>
    %171 = arith.mulf %170, %170 : vector<8x64xf32>
    %cst_54 = arith.constant dense<0.000000e+00> : vector<8xf32>
    %172 = vector.multi_reduction <add>, %171, %cst_54 [1] : vector<8x64xf32> to vector<8xf32>
    %173 = vector.shape_cast %172 : vector<8xf32> to vector<8x1xf32>
    %cst_55 = arith.constant 6.400000e+01 : f32
    %174 = vector.broadcast %cst_55 : f32 to vector<8x1xf32>
    %175 = arith.divf %173, %174 : vector<8x1xf32>
    %176 = vector.broadcast %168 : vector<8x1xf32> to vector<8x64xf32>
    %177 = arith.subf %164, %176 : vector<8x64xf32>
    %cst_56 = arith.constant 9.99999974E-6 : f32
    %178 = vector.broadcast %cst_56 : f32 to vector<8x1xf32>
    %179 = arith.addf %175, %178 : vector<8x1xf32>
    %180 = math.rsqrt %179 : vector<8x1xf32>
    %181 = vector.broadcast %180 : vector<8x1xf32> to vector<8x64xf32>
    %182 = arith.mulf %177, %181 : vector<8x64xf32>
    %183 = vector.broadcast %20 : vector<1x64xf32> to vector<8x64xf32>
    %184 = arith.mulf %182, %183 : vector<8x64xf32>
    %185 = vector.broadcast %21 : vector<1x64xf32> to vector<8x64xf32>
    %186 = arith.addf %184, %185 : vector<8x64xf32>
    %187 = arith.truncf %186 : vector<8x64xf32> to vector<8x64xbf16>
    %c0_57 = arith.constant 0 : index
    %c0_58 = arith.constant 0 : index
    %c0_59 = arith.constant 0 : index
    %188 = vector.load %arg8[%c0_57, %c0_58, %c0_59] : memref<2x64x256xbf16, #tpu.memory_space<vmem>>, vector<1x64x256xbf16>
    %189 = vector.shape_cast %188 : vector<1x64x256xbf16> to vector<64x256xbf16>
    %cst_60 = arith.constant dense<0.000000e+00> : vector<8x256xf32>
    %190 = tpu.matmul %187, %189, %cst_60 {dimension_numbers = #tpu.dot_dimension_numbers<[1], [0], [0], [1], [0, 0, 1, 1], [], []>} : vector<8x64xbf16>, vector<64x256xbf16>, vector<8x256xf32> -> vector<8x256xf32>
    %c0_61 = arith.constant 0 : index
    %c0_62 = arith.constant 0 : index
    %c0_63 = arith.constant 0 : index
    %191 = vector.load %arg9[%c0_61, %c0_62, %c0_63] : memref<2x1x256xf32, #tpu.memory_space<vmem>>, vector<1x1x256xf32>
    %192 = vector.shape_cast %191 : vector<1x1x256xf32> to vector<1x256xf32>
    %193 = vector.broadcast %192 : vector<1x256xf32> to vector<8x256xf32>
    %194 = arith.addf %190, %193 : vector<8x256xf32>
    %cst_64 = arith.constant 1.702000e+00 : f32
    %195 = vector.broadcast %cst_64 : f32 to vector<8x256xf32>
    %196 = arith.mulf %195, %194 : vector<8x256xf32>
    %197 = arith.negf %196 : vector<8x256xf32>
    %198 = math.exp %197 : vector<8x256xf32>
    %cst_65 = arith.constant 1.000000e+00 : f32
    %199 = vector.broadcast %cst_65 : f32 to vector<8x256xf32>
    %200 = arith.addf %199, %198 : vector<8x256xf32>
    %201 = arith.divf %199, %200 : vector<8x256xf32>
    %202 = arith.mulf %194, %201 : vector<8x256xf32>
    %203 = arith.truncf %202 : vector<8x256xf32> to vector<8x256xbf16>
    %c0_66 = arith.constant 0 : index
    %c0_67 = arith.constant 0 : index
    %c0_68 = arith.constant 0 : index
    %204 = vector.load %arg10[%c0_66, %c0_67, %c0_68] : memref<2x256x64xbf16, #tpu.memory_space<vmem>>, vector<1x256x64xbf16>
    %205 = vector.shape_cast %204 : vector<1x256x64xbf16> to vector<256x64xbf16>
    %cst_69 = arith.constant dense<0.000000e+00> : vector<8x64xf32>
    %206 = tpu.matmul %203, %205, %cst_69 {dimension_numbers = #tpu.dot_dimension_numbers<[1], [0], [0], [1], [0, 0, 1, 1], [], []>} : vector<8x256xbf16>, vector<256x64xbf16>, vector<8x64xf32> -> vector<8x64xf32>
    %207 = vector.broadcast %23 : vector<1x64xf32> to vector<8x64xf32>
    %208 = arith.addf %206, %207 : vector<8x64xf32>
    %209 = arith.addf %164, %208 : vector<8x64xf32>
    %c1 = arith.constant 1 : index
    %c0_70 = arith.constant 0 : index
    %c0_71 = arith.constant 0 : index
    %210 = vector.load %arg4[%c1, %c0_70, %c0_71] : memref<2x6x64xf32, #tpu.memory_space<vmem>>, vector<1x6x64xf32>
    %211 = vector.shape_cast %210 : vector<1x6x64xf32> to vector<6x64xf32>
    %212 = vector.extract_strided_slice %211 {offsets = [0, 0], sizes = [1, 64], strides = [1, 1]} : vector<6x64xf32> to vector<1x64xf32>
    %213 = vector.extract_strided_slice %211 {offsets = [1, 0], sizes = [1, 64], strides = [1, 1]} : vector<6x64xf32> to vector<1x64xf32>
    %214 = vector.extract_strided_slice %211 {offsets = [2, 0], sizes = [1, 64], strides = [1, 1]} : vector<6x64xf32> to vector<1x64xf32>
    %215 = vector.extract_strided_slice %211 {offsets = [3, 0], sizes = [1, 64], strides = [1, 1]} : vector<6x64xf32> to vector<1x64xf32>
    %216 = vector.extract_strided_slice %211 {offsets = [4, 0], sizes = [1, 64], strides = [1, 1]} : vector<6x64xf32> to vector<1x64xf32>
    %217 = vector.extract_strided_slice %211 {offsets = [5, 0], sizes = [1, 64], strides = [1, 1]} : vector<6x64xf32> to vector<1x64xf32>
    %c1_72 = arith.constant 1 : index
    %c0_73 = arith.constant 0 : index
    %c0_74 = arith.constant 0 : index
    %218 = vector.load %arg7[%c1_72, %c0_73, %c0_74] : memref<2x64x64xbf16, #tpu.memory_space<vmem>>, vector<1x64x64xbf16>
    %219 = vector.shape_cast %218 : vector<1x64x64xbf16> to vector<64x64xbf16>
    %cst_75 = arith.constant dense<0.000000e+00> : vector<8xf32>
    %220 = vector.multi_reduction <add>, %209, %cst_75 [1] : vector<8x64xf32> to vector<8xf32>
    %221 = vector.shape_cast %220 : vector<8xf32> to vector<8x1xf32>
    %cst_76 = arith.constant 6.400000e+01 : f32
    %222 = vector.broadcast %cst_76 : f32 to vector<8x1xf32>
    %223 = arith.divf %221, %222 : vector<8x1xf32>
    %224 = vector.broadcast %223 : vector<8x1xf32> to vector<8x64xf32>
    %225 = arith.subf %209, %224 : vector<8x64xf32>
    %226 = arith.mulf %225, %225 : vector<8x64xf32>
    %cst_77 = arith.constant dense<0.000000e+00> : vector<8xf32>
    %227 = vector.multi_reduction <add>, %226, %cst_77 [1] : vector<8x64xf32> to vector<8xf32>
    %228 = vector.shape_cast %227 : vector<8xf32> to vector<8x1xf32>
    %cst_78 = arith.constant 6.400000e+01 : f32
    %229 = vector.broadcast %cst_78 : f32 to vector<8x1xf32>
    %230 = arith.divf %228, %229 : vector<8x1xf32>
    %231 = vector.broadcast %223 : vector<8x1xf32> to vector<8x64xf32>
    %232 = arith.subf %209, %231 : vector<8x64xf32>
    %cst_79 = arith.constant 9.99999974E-6 : f32
    %233 = vector.broadcast %cst_79 : f32 to vector<8x1xf32>
    %234 = arith.addf %230, %233 : vector<8x1xf32>
    %235 = math.rsqrt %234 : vector<8x1xf32>
    %236 = vector.broadcast %235 : vector<8x1xf32> to vector<8x64xf32>
    %237 = arith.mulf %232, %236 : vector<8x64xf32>
    %238 = vector.broadcast %212 : vector<1x64xf32> to vector<8x64xf32>
    %239 = arith.mulf %237, %238 : vector<8x64xf32>
    %240 = vector.broadcast %213 : vector<1x64xf32> to vector<8x64xf32>
    %241 = arith.addf %239, %240 : vector<8x64xf32>
    %242 = arith.truncf %241 : vector<8x64xf32> to vector<8x64xbf16>
    %c1_80 = arith.constant 1 : index
    %c0_81 = arith.constant 0 : index
    %c0_82 = arith.constant 0 : index
    %243 = vector.load %arg5[%c1_80, %c0_81, %c0_82] : memref<2x64x192xbf16, #tpu.memory_space<vmem>>, vector<1x64x192xbf16>
    %244 = vector.shape_cast %243 : vector<1x64x192xbf16> to vector<64x192xbf16>
    %cst_83 = arith.constant dense<0.000000e+00> : vector<8x192xf32>
    %245 = tpu.matmul %242, %244, %cst_83 {dimension_numbers = #tpu.dot_dimension_numbers<[1], [0], [0], [1], [0, 0, 1, 1], [], []>} : vector<8x64xbf16>, vector<64x192xbf16>, vector<8x192xf32> -> vector<8x192xf32>
    %c1_84 = arith.constant 1 : index
    %c0_85 = arith.constant 0 : index
    %c0_86 = arith.constant 0 : index
    %246 = vector.load %arg6[%c1_84, %c0_85, %c0_86] : memref<2x1x192xf32, #tpu.memory_space<vmem>>, vector<1x1x192xf32>
    %247 = vector.shape_cast %246 : vector<1x1x192xf32> to vector<1x192xf32>
    %248 = vector.broadcast %247 : vector<1x192xf32> to vector<8x192xf32>
    %249 = arith.addf %245, %248 : vector<8x192xf32>
    %250 = vector.extract_strided_slice %249 {offsets = [0, 0], sizes = [8, 64], strides = [1, 1]} : vector<8x192xf32> to vector<8x64xf32>
    %cst_87 = arith.constant 2.500000e-01 : f32
    %251 = vector.broadcast %cst_87 : f32 to vector<8x64xf32>
    %252 = arith.mulf %250, %251 : vector<8x64xf32>
    %253 = vector.extract_strided_slice %249 {offsets = [0, 64], sizes = [8, 64], strides = [1, 1]} : vector<8x192xf32> to vector<8x64xf32>
    %254 = vector.extract_strided_slice %249 {offsets = [0, 128], sizes = [8, 64], strides = [1, 1]} : vector<8x192xf32> to vector<8x64xf32>
    %cst_88 = arith.constant 0.000000e+00 : f32
    %255 = vector.broadcast %cst_88 : f32 to vector<8x64xf32>
    %256 = vector.extract_strided_slice %252 {offsets = [0, 0], sizes = [8, 16], strides = [1, 1]} : vector<8x64xf32> to vector<8x16xf32>
    %257 = arith.truncf %256 : vector<8x16xf32> to vector<8x16xbf16>
    %258 = vector.extract_strided_slice %253 {offsets = [0, 0], sizes = [8, 16], strides = [1, 1]} : vector<8x64xf32> to vector<8x16xf32>
    %259 = arith.truncf %258 : vector<8x16xf32> to vector<8x16xbf16>
    "tpu.trace_start"() <{level = 10 : i32, message = "qd,kd->qk"}> : () -> ()
    %cst_89 = arith.constant dense<0.000000e+00> : vector<8x8xf32>
    %260 = tpu.matmul %257, %259, %cst_89 {dimension_numbers = #tpu.dot_dimension_numbers<[1], [1], [0], [0], [0, 0, 1, 0], [], []>} : vector<8x16xbf16>, vector<8x16xbf16>, vector<8x8xf32> -> vector<8x8xf32>
    "tpu.trace_stop"() : () -> ()
    %261 = arith.addf %260, %15 : vector<8x8xf32>
    %cst_90 = arith.constant dense<0xFF800000> : vector<8xf32>
    %262 = vector.multi_reduction <maximumf>, %261, %cst_90 [1] : vector<8x8xf32> to vector<8xf32>
    %cst_91 = arith.constant 0xFF800000 : f32
    %263 = vector.broadcast %cst_91 : f32 to vector<8xf32>
    %264 = arith.maximumf %263, %262 : vector<8xf32>
    %265 = vector.shape_cast %264 : vector<8xf32> to vector<8x1xf32>
    %266 = vector.broadcast %265 : vector<8x1xf32> to vector<8x8xf32>
    %267 = arith.subf %261, %266 : vector<8x8xf32>
    %268 = math.exp %267 : vector<8x8xf32>
    %cst_92 = arith.constant dense<0.000000e+00> : vector<8xf32>
    %269 = vector.multi_reduction <add>, %268, %cst_92 [1] : vector<8x8xf32> to vector<8xf32>
    %270 = vector.shape_cast %269 : vector<8xf32> to vector<8x1xf32>
    %271 = vector.broadcast %270 : vector<8x1xf32> to vector<8x8xf32>
    %272 = arith.divf %268, %271 : vector<8x8xf32>
    %273 = arith.truncf %272 : vector<8x8xf32> to vector<8x8xbf16>
    %274 = vector.extract_strided_slice %254 {offsets = [0, 0], sizes = [8, 16], strides = [1, 1]} : vector<8x64xf32> to vector<8x16xf32>
    %275 = arith.truncf %274 : vector<8x16xf32> to vector<8x16xbf16>
    %cst_93 = arith.constant dense<0.000000e+00> : vector<8x16xf32>
    %276 = tpu.matmul %273, %275, %cst_93 {dimension_numbers = #tpu.dot_dimension_numbers<[1], [0], [0], [1], [0, 0, 1, 1], [], []>} : vector<8x8xbf16>, vector<8x16xbf16>, vector<8x16xf32> -> vector<8x16xf32>
    %277 = arith.truncf %276 : vector<8x16xf32> to vector<8x16xbf16>
    %278 = vector.extract_strided_slice %219 {offsets = [0, 0], sizes = [16, 64], strides = [1, 1]} : vector<64x64xbf16> to vector<16x64xbf16>
    %cst_94 = arith.constant dense<0.000000e+00> : vector<8x64xf32>
    %279 = tpu.matmul %277, %278, %cst_94 {dimension_numbers = #tpu.dot_dimension_numbers<[1], [0], [0], [1], [0, 0, 1, 1], [], []>} : vector<8x16xbf16>, vector<16x64xbf16>, vector<8x64xf32> -> vector<8x64xf32>
    %280 = arith.addf %255, %279 : vector<8x64xf32>
    %281 = vector.extract_strided_slice %252 {offsets = [0, 16], sizes = [8, 16], strides = [1, 1]} : vector<8x64xf32> to vector<8x16xf32>
    %282 = arith.truncf %281 : vector<8x16xf32> to vector<8x16xbf16>
    %283 = vector.extract_strided_slice %253 {offsets = [0, 16], sizes = [8, 16], strides = [1, 1]} : vector<8x64xf32> to vector<8x16xf32>
    %284 = arith.truncf %283 : vector<8x16xf32> to vector<8x16xbf16>
    "tpu.trace_start"() <{level = 10 : i32, message = "qd,kd->qk"}> : () -> ()
    %cst_95 = arith.constant dense<0.000000e+00> : vector<8x8xf32>
    %285 = tpu.matmul %282, %284, %cst_95 {dimension_numbers = #tpu.dot_dimension_numbers<[1], [1], [0], [0], [0, 0, 1, 0], [], []>} : vector<8x16xbf16>, vector<8x16xbf16>, vector<8x8xf32> -> vector<8x8xf32>
    "tpu.trace_stop"() : () -> ()
    %286 = arith.addf %285, %15 : vector<8x8xf32>
    %cst_96 = arith.constant dense<0xFF800000> : vector<8xf32>
    %287 = vector.multi_reduction <maximumf>, %286, %cst_96 [1] : vector<8x8xf32> to vector<8xf32>
    %cst_97 = arith.constant 0xFF800000 : f32
    %288 = vector.broadcast %cst_97 : f32 to vector<8xf32>
    %289 = arith.maximumf %288, %287 : vector<8xf32>
    %290 = vector.shape_cast %289 : vector<8xf32> to vector<8x1xf32>
    %291 = vector.broadcast %290 : vector<8x1xf32> to vector<8x8xf32>
    %292 = arith.subf %286, %291 : vector<8x8xf32>
    %293 = math.exp %292 : vector<8x8xf32>
    %cst_98 = arith.constant dense<0.000000e+00> : vector<8xf32>
    %294 = vector.multi_reduction <add>, %293, %cst_98 [1] : vector<8x8xf32> to vector<8xf32>
    %295 = vector.shape_cast %294 : vector<8xf32> to vector<8x1xf32>
    %296 = vector.broadcast %295 : vector<8x1xf32> to vector<8x8xf32>
    %297 = arith.divf %293, %296 : vector<8x8xf32>
    %298 = arith.truncf %297 : vector<8x8xf32> to vector<8x8xbf16>
    %299 = vector.extract_strided_slice %254 {offsets = [0, 16], sizes = [8, 16], strides = [1, 1]} : vector<8x64xf32> to vector<8x16xf32>
    %300 = arith.truncf %299 : vector<8x16xf32> to vector<8x16xbf16>
    %cst_99 = arith.constant dense<0.000000e+00> : vector<8x16xf32>
    %301 = tpu.matmul %298, %300, %cst_99 {dimension_numbers = #tpu.dot_dimension_numbers<[1], [0], [0], [1], [0, 0, 1, 1], [], []>} : vector<8x8xbf16>, vector<8x16xbf16>, vector<8x16xf32> -> vector<8x16xf32>
    %302 = arith.truncf %301 : vector<8x16xf32> to vector<8x16xbf16>
    %303 = vector.extract_strided_slice %219 {offsets = [16, 0], sizes = [16, 64], strides = [1, 1]} : vector<64x64xbf16> to vector<16x64xbf16>
    %cst_100 = arith.constant dense<0.000000e+00> : vector<8x64xf32>
    %304 = tpu.matmul %302, %303, %cst_100 {dimension_numbers = #tpu.dot_dimension_numbers<[1], [0], [0], [1], [0, 0, 1, 1], [], []>} : vector<8x16xbf16>, vector<16x64xbf16>, vector<8x64xf32> -> vector<8x64xf32>
    %305 = arith.addf %280, %304 : vector<8x64xf32>
    %306 = vector.extract_strided_slice %252 {offsets = [0, 32], sizes = [8, 16], strides = [1, 1]} : vector<8x64xf32> to vector<8x16xf32>
    %307 = arith.truncf %306 : vector<8x16xf32> to vector<8x16xbf16>
    %308 = vector.extract_strided_slice %253 {offsets = [0, 32], sizes = [8, 16], strides = [1, 1]} : vector<8x64xf32> to vector<8x16xf32>
    %309 = arith.truncf %308 : vector<8x16xf32> to vector<8x16xbf16>
    "tpu.trace_start"() <{level = 10 : i32, message = "qd,kd->qk"}> : () -> ()
    %cst_101 = arith.constant dense<0.000000e+00> : vector<8x8xf32>
    %310 = tpu.matmul %307, %309, %cst_101 {dimension_numbers = #tpu.dot_dimension_numbers<[1], [1], [0], [0], [0, 0, 1, 0], [], []>} : vector<8x16xbf16>, vector<8x16xbf16>, vector<8x8xf32> -> vector<8x8xf32>
    "tpu.trace_stop"() : () -> ()
    %311 = arith.addf %310, %15 : vector<8x8xf32>
    %cst_102 = arith.constant dense<0xFF800000> : vector<8xf32>
    %312 = vector.multi_reduction <maximumf>, %311, %cst_102 [1] : vector<8x8xf32> to vector<8xf32>
    %cst_103 = arith.constant 0xFF800000 : f32
    %313 = vector.broadcast %cst_103 : f32 to vector<8xf32>
    %314 = arith.maximumf %313, %312 : vector<8xf32>
    %315 = vector.shape_cast %314 : vector<8xf32> to vector<8x1xf32>
    %316 = vector.broadcast %315 : vector<8x1xf32> to vector<8x8xf32>
    %317 = arith.subf %311, %316 : vector<8x8xf32>
    %318 = math.exp %317 : vector<8x8xf32>
    %cst_104 = arith.constant dense<0.000000e+00> : vector<8xf32>
    %319 = vector.multi_reduction <add>, %318, %cst_104 [1] : vector<8x8xf32> to vector<8xf32>
    %320 = vector.shape_cast %319 : vector<8xf32> to vector<8x1xf32>
    %321 = vector.broadcast %320 : vector<8x1xf32> to vector<8x8xf32>
    %322 = arith.divf %318, %321 : vector<8x8xf32>
    %323 = arith.truncf %322 : vector<8x8xf32> to vector<8x8xbf16>
    %324 = vector.extract_strided_slice %254 {offsets = [0, 32], sizes = [8, 16], strides = [1, 1]} : vector<8x64xf32> to vector<8x16xf32>
    %325 = arith.truncf %324 : vector<8x16xf32> to vector<8x16xbf16>
    %cst_105 = arith.constant dense<0.000000e+00> : vector<8x16xf32>
    %326 = tpu.matmul %323, %325, %cst_105 {dimension_numbers = #tpu.dot_dimension_numbers<[1], [0], [0], [1], [0, 0, 1, 1], [], []>} : vector<8x8xbf16>, vector<8x16xbf16>, vector<8x16xf32> -> vector<8x16xf32>
    %327 = arith.truncf %326 : vector<8x16xf32> to vector<8x16xbf16>
    %328 = vector.extract_strided_slice %219 {offsets = [32, 0], sizes = [16, 64], strides = [1, 1]} : vector<64x64xbf16> to vector<16x64xbf16>
    %cst_106 = arith.constant dense<0.000000e+00> : vector<8x64xf32>
    %329 = tpu.matmul %327, %328, %cst_106 {dimension_numbers = #tpu.dot_dimension_numbers<[1], [0], [0], [1], [0, 0, 1, 1], [], []>} : vector<8x16xbf16>, vector<16x64xbf16>, vector<8x64xf32> -> vector<8x64xf32>
    %330 = arith.addf %305, %329 : vector<8x64xf32>
    %331 = vector.extract_strided_slice %252 {offsets = [0, 48], sizes = [8, 16], strides = [1, 1]} : vector<8x64xf32> to vector<8x16xf32>
    %332 = arith.truncf %331 : vector<8x16xf32> to vector<8x16xbf16>
    %333 = vector.extract_strided_slice %253 {offsets = [0, 48], sizes = [8, 16], strides = [1, 1]} : vector<8x64xf32> to vector<8x16xf32>
    %334 = arith.truncf %333 : vector<8x16xf32> to vector<8x16xbf16>
    "tpu.trace_start"() <{level = 10 : i32, message = "qd,kd->qk"}> : () -> ()
    %cst_107 = arith.constant dense<0.000000e+00> : vector<8x8xf32>
    %335 = tpu.matmul %332, %334, %cst_107 {dimension_numbers = #tpu.dot_dimension_numbers<[1], [1], [0], [0], [0, 0, 1, 0], [], []>} : vector<8x16xbf16>, vector<8x16xbf16>, vector<8x8xf32> -> vector<8x8xf32>
    "tpu.trace_stop"() : () -> ()
    %336 = arith.addf %335, %15 : vector<8x8xf32>
    %cst_108 = arith.constant dense<0xFF800000> : vector<8xf32>
    %337 = vector.multi_reduction <maximumf>, %336, %cst_108 [1] : vector<8x8xf32> to vector<8xf32>
    %cst_109 = arith.constant 0xFF800000 : f32
    %338 = vector.broadcast %cst_109 : f32 to vector<8xf32>
    %339 = arith.maximumf %338, %337 : vector<8xf32>
    %340 = vector.shape_cast %339 : vector<8xf32> to vector<8x1xf32>
    %341 = vector.broadcast %340 : vector<8x1xf32> to vector<8x8xf32>
    %342 = arith.subf %336, %341 : vector<8x8xf32>
    %343 = math.exp %342 : vector<8x8xf32>
    %cst_110 = arith.constant dense<0.000000e+00> : vector<8xf32>
    %344 = vector.multi_reduction <add>, %343, %cst_110 [1] : vector<8x8xf32> to vector<8xf32>
    %345 = vector.shape_cast %344 : vector<8xf32> to vector<8x1xf32>
    %346 = vector.broadcast %345 : vector<8x1xf32> to vector<8x8xf32>
    %347 = arith.divf %343, %346 : vector<8x8xf32>
    %348 = arith.truncf %347 : vector<8x8xf32> to vector<8x8xbf16>
    %349 = vector.extract_strided_slice %254 {offsets = [0, 48], sizes = [8, 16], strides = [1, 1]} : vector<8x64xf32> to vector<8x16xf32>
    %350 = arith.truncf %349 : vector<8x16xf32> to vector<8x16xbf16>
    %cst_111 = arith.constant dense<0.000000e+00> : vector<8x16xf32>
    %351 = tpu.matmul %348, %350, %cst_111 {dimension_numbers = #tpu.dot_dimension_numbers<[1], [0], [0], [1], [0, 0, 1, 1], [], []>} : vector<8x8xbf16>, vector<8x16xbf16>, vector<8x16xf32> -> vector<8x16xf32>
    %352 = arith.truncf %351 : vector<8x16xf32> to vector<8x16xbf16>
    %353 = vector.extract_strided_slice %219 {offsets = [48, 0], sizes = [16, 64], strides = [1, 1]} : vector<64x64xbf16> to vector<16x64xbf16>
    %cst_112 = arith.constant dense<0.000000e+00> : vector<8x64xf32>
    %354 = tpu.matmul %352, %353, %cst_112 {dimension_numbers = #tpu.dot_dimension_numbers<[1], [0], [0], [1], [0, 0, 1, 1], [], []>} : vector<8x16xbf16>, vector<16x64xbf16>, vector<8x64xf32> -> vector<8x64xf32>
    %355 = arith.addf %330, %354 : vector<8x64xf32>
    %356 = arith.addf %209, %355 : vector<8x64xf32>
    %357 = vector.broadcast %216 : vector<1x64xf32> to vector<8x64xf32>
    %358 = arith.addf %356, %357 : vector<8x64xf32>
    %cst_113 = arith.constant dense<0.000000e+00> : vector<8xf32>
    %359 = vector.multi_reduction <add>, %358, %cst_113 [1] : vector<8x64xf32> to vector<8xf32>
    %360 = vector.shape_cast %359 : vector<8xf32> to vector<8x1xf32>
    %cst_114 = arith.constant 6.400000e+01 : f32
    %361 = vector.broadcast %cst_114 : f32 to vector<8x1xf32>
    %362 = arith.divf %360, %361 : vector<8x1xf32>
    %363 = vector.broadcast %362 : vector<8x1xf32> to vector<8x64xf32>
    %364 = arith.subf %358, %363 : vector<8x64xf32>
    %365 = arith.mulf %364, %364 : vector<8x64xf32>
    %cst_115 = arith.constant dense<0.000000e+00> : vector<8xf32>
    %366 = vector.multi_reduction <add>, %365, %cst_115 [1] : vector<8x64xf32> to vector<8xf32>
    %367 = vector.shape_cast %366 : vector<8xf32> to vector<8x1xf32>
    %cst_116 = arith.constant 6.400000e+01 : f32
    %368 = vector.broadcast %cst_116 : f32 to vector<8x1xf32>
    %369 = arith.divf %367, %368 : vector<8x1xf32>
    %370 = vector.broadcast %362 : vector<8x1xf32> to vector<8x64xf32>
    %371 = arith.subf %358, %370 : vector<8x64xf32>
    %cst_117 = arith.constant 9.99999974E-6 : f32
    %372 = vector.broadcast %cst_117 : f32 to vector<8x1xf32>
    %373 = arith.addf %369, %372 : vector<8x1xf32>
    %374 = math.rsqrt %373 : vector<8x1xf32>
    %375 = vector.broadcast %374 : vector<8x1xf32> to vector<8x64xf32>
    %376 = arith.mulf %371, %375 : vector<8x64xf32>
    %377 = vector.broadcast %214 : vector<1x64xf32> to vector<8x64xf32>
    %378 = arith.mulf %376, %377 : vector<8x64xf32>
    %379 = vector.broadcast %215 : vector<1x64xf32> to vector<8x64xf32>
    %380 = arith.addf %378, %379 : vector<8x64xf32>
    %381 = arith.truncf %380 : vector<8x64xf32> to vector<8x64xbf16>
    %c1_118 = arith.constant 1 : index
    %c0_119 = arith.constant 0 : index
    %c0_120 = arith.constant 0 : index
    %382 = vector.load %arg8[%c1_118, %c0_119, %c0_120] : memref<2x64x256xbf16, #tpu.memory_space<vmem>>, vector<1x64x256xbf16>
    %383 = vector.shape_cast %382 : vector<1x64x256xbf16> to vector<64x256xbf16>
    %cst_121 = arith.constant dense<0.000000e+00> : vector<8x256xf32>
    %384 = tpu.matmul %381, %383, %cst_121 {dimension_numbers = #tpu.dot_dimension_numbers<[1], [0], [0], [1], [0, 0, 1, 1], [], []>} : vector<8x64xbf16>, vector<64x256xbf16>, vector<8x256xf32> -> vector<8x256xf32>
    %c1_122 = arith.constant 1 : index
    %c0_123 = arith.constant 0 : index
    %c0_124 = arith.constant 0 : index
    %385 = vector.load %arg9[%c1_122, %c0_123, %c0_124] : memref<2x1x256xf32, #tpu.memory_space<vmem>>, vector<1x1x256xf32>
    %386 = vector.shape_cast %385 : vector<1x1x256xf32> to vector<1x256xf32>
    %387 = vector.broadcast %386 : vector<1x256xf32> to vector<8x256xf32>
    %388 = arith.addf %384, %387 : vector<8x256xf32>
    %cst_125 = arith.constant 1.702000e+00 : f32
    %389 = vector.broadcast %cst_125 : f32 to vector<8x256xf32>
    %390 = arith.mulf %389, %388 : vector<8x256xf32>
    %391 = arith.negf %390 : vector<8x256xf32>
    %392 = math.exp %391 : vector<8x256xf32>
    %cst_126 = arith.constant 1.000000e+00 : f32
    %393 = vector.broadcast %cst_126 : f32 to vector<8x256xf32>
    %394 = arith.addf %393, %392 : vector<8x256xf32>
    %395 = arith.divf %393, %394 : vector<8x256xf32>
    %396 = arith.mulf %388, %395 : vector<8x256xf32>
    %397 = arith.truncf %396 : vector<8x256xf32> to vector<8x256xbf16>
    %c1_127 = arith.constant 1 : index
    %c0_128 = arith.constant 0 : index
    %c0_129 = arith.constant 0 : index
    %398 = vector.load %arg10[%c1_127, %c0_128, %c0_129] : memref<2x256x64xbf16, #tpu.memory_space<vmem>>, vector<1x256x64xbf16>
    %399 = vector.shape_cast %398 : vector<1x256x64xbf16> to vector<256x64xbf16>
    %cst_130 = arith.constant dense<0.000000e+00> : vector<8x64xf32>
    %400 = tpu.matmul %397, %399, %cst_130 {dimension_numbers = #tpu.dot_dimension_numbers<[1], [0], [0], [1], [0, 0, 1, 1], [], []>} : vector<8x256xbf16>, vector<256x64xbf16>, vector<8x64xf32> -> vector<8x64xf32>
    %401 = vector.broadcast %217 : vector<1x64xf32> to vector<8x64xf32>
    %402 = arith.addf %400, %401 : vector<8x64xf32>
    %403 = arith.addf %358, %402 : vector<8x64xf32>
    %404 = arith.index_cast %arg0 : i32 to index
    %405 = memref.load %arg1[%404] : memref<2xi32, #tpu.memory_space<smem>>
    %406 = tpu.iota {dimensions = array<i32: 0>} : vector<8x1xi32>
    %407 = vector.broadcast %405 : i32 to vector<8x1xi32>
    %408 = arith.cmpi eq, %406, %407 : vector<8x1xi32>
    %409 = arith.extui %408 : vector<8x1xi1> to vector<8x1xi32>
    %410 = arith.sitofp %409 : vector<8x1xi32> to vector<8x1xf32>
    %411 = vector.broadcast %410 : vector<8x1xf32> to vector<8x64xf32>
    %412 = arith.mulf %403, %411 : vector<8x64xf32>
    %cst_131 = arith.constant dense<0.000000e+00> : vector<64xf32>
    %413 = vector.multi_reduction <add>, %412, %cst_131 [0] : vector<8x64xf32> to vector<64xf32>
    %414 = vector.shape_cast %413 : vector<64xf32> to vector<1x64xf32>
    %c0_132 = arith.constant 0 : index
    %c0_133 = arith.constant 0 : index
    %415 = vector.load %arg11[%c0_132, %c0_133] : memref<2x64xf32, #tpu.memory_space<vmem>>, vector<2x64xf32>
    %416 = vector.extract_strided_slice %415 {offsets = [0, 0], sizes = [1, 64], strides = [1, 1]} : vector<2x64xf32> to vector<1x64xf32>
    %417 = vector.extract_strided_slice %415 {offsets = [1, 0], sizes = [1, 64], strides = [1, 1]} : vector<2x64xf32> to vector<1x64xf32>
    %cst_134 = arith.constant dense<0.000000e+00> : vector<1xf32>
    %418 = vector.multi_reduction <add>, %414, %cst_134 [1] : vector<1x64xf32> to vector<1xf32>
    %419 = vector.shape_cast %418 : vector<1xf32> to vector<1x1xf32>
    %cst_135 = arith.constant 6.400000e+01 : f32
    %420 = vector.broadcast %cst_135 : f32 to vector<1x1xf32>
    %421 = arith.divf %419, %420 : vector<1x1xf32>
    %422 = vector.broadcast %421 : vector<1x1xf32> to vector<1x64xf32>
    %423 = arith.subf %414, %422 : vector<1x64xf32>
    %424 = arith.mulf %423, %423 : vector<1x64xf32>
    %cst_136 = arith.constant dense<0.000000e+00> : vector<1xf32>
    %425 = vector.multi_reduction <add>, %424, %cst_136 [1] : vector<1x64xf32> to vector<1xf32>
    %426 = vector.shape_cast %425 : vector<1xf32> to vector<1x1xf32>
    %cst_137 = arith.constant 6.400000e+01 : f32
    %427 = vector.broadcast %cst_137 : f32 to vector<1x1xf32>
    %428 = arith.divf %426, %427 : vector<1x1xf32>
    %429 = vector.broadcast %421 : vector<1x1xf32> to vector<1x64xf32>
    %430 = arith.subf %414, %429 : vector<1x64xf32>
    %cst_138 = arith.constant 9.99999974E-6 : f32
    %431 = vector.broadcast %cst_138 : f32 to vector<1x1xf32>
    %432 = arith.addf %428, %431 : vector<1x1xf32>
    %433 = math.rsqrt %432 : vector<1x1xf32>
    %434 = vector.broadcast %433 : vector<1x1xf32> to vector<1x64xf32>
    %435 = arith.mulf %430, %434 : vector<1x64xf32>
    %436 = arith.mulf %435, %416 : vector<1x64xf32>
    %437 = arith.addf %436, %417 : vector<1x64xf32>
    %438 = arith.truncf %437 : vector<1x64xf32> to vector<1x64xbf16>
    %c0_139 = arith.constant 0 : index
    %c0_140 = arith.constant 0 : index
    %439 = vector.load %arg12[%c0_139, %c0_140] : memref<64x64xbf16, #tpu.memory_space<vmem>>, vector<64x64xbf16>
    %cst_141 = arith.constant dense<0.000000e+00> : vector<1x64xf32>
    %440 = tpu.matmul %438, %439, %cst_141 {dimension_numbers = #tpu.dot_dimension_numbers<[1], [0], [0], [1], [0, 0, 1, 1], [], []>} : vector<1x64xbf16>, vector<64x64xbf16>, vector<1x64xf32> -> vector<1x64xf32>
    %441 = arith.truncf %440 : vector<1x64xf32> to vector<1x64xbf16>
    %c0_142 = arith.constant 0 : index
    %c0_143 = arith.constant 0 : index
    %442 = vector.load %arg13[%c0_142, %c0_143] : memref<64x512xbf16, #tpu.memory_space<vmem>>, vector<64x512xbf16>
    %cst_144 = arith.constant dense<0.000000e+00> : vector<1x512xf32>
    %443 = tpu.matmul %441, %442, %cst_144 {dimension_numbers = #tpu.dot_dimension_numbers<[1], [0], [0], [1], [0, 0, 1, 1], [], []>} : vector<1x64xbf16>, vector<64x512xbf16>, vector<1x512xf32> -> vector<1x512xf32>
    %c0_145 = arith.constant 0 : index
    %c0_146 = arith.constant 0 : index
    %444 = vector.load %arg14[%c0_145, %c0_146] : memref<1x512xf32, #tpu.memory_space<vmem>>, vector<1x512xf32>
    %445 = arith.addf %443, %444 : vector<1x512xf32>
    %c0_147 = arith.constant 0 : index
    %c0_148 = arith.constant 0 : index
    %c0_149 = arith.constant 0 : index
    %446 = vector.load %arg15[%c0_147, %c0_148, %c0_149] : memref<1x1x512xf32, #tpu.memory_space<vmem>>, vector<1x1x512xf32>
    %447 = vector.shape_cast %446 : vector<1x1x512xf32> to vector<1x512xf32>
    %448 = vector.shape_cast %445 : vector<1x512xf32> to vector<1x1x512xf32>
    tpu.vector_store %arg15[%c0_147, %c0_148, %c0_149], %448 {strides = array<i32>} : memref<1x1x512xf32, #tpu.memory_space<vmem>>, vector<1x1x512xf32>,
    return
  }
  func.func @transform_0(%arg0: i32, %arg1: memref<2xi32, #tpu.memory_space<smem>>) -> (i32, i32, i32) {
    %c0_i32 = arith.constant 0 : i32
    %c0_i32_0 = arith.constant 0 : i32
    %c0_i32_1 = arith.constant 0 : i32
    return %arg0, %c0_i32, %c0_i32_0 : i32, i32, i32
  }
  func.func @transform_1(%arg0: i32, %arg1: memref<2xi32, #tpu.memory_space<smem>>) -> (i32, i32, i32) {
    %c0_i32 = arith.constant 0 : i32
    %c0_i32_0 = arith.constant 0 : i32
    %c0_i32_1 = arith.constant 0 : i32
    return %arg0, %c0_i32, %c0_i32_0 : i32, i32, i32
  }
  func.func @transform_2(%arg0: i32, %arg1: memref<2xi32, #tpu.memory_space<smem>>) -> (i32, i32, i32) {
    %c0_i32 = arith.constant 0 : i32
    %c0_i32_0 = arith.constant 0 : i32
    %c0_i32_1 = arith.constant 0 : i32
    %c0_i32_2 = arith.constant 0 : i32
    return %c0_i32, %c0_i32_0, %c0_i32_1 : i32, i32, i32
  }
  func.func @transform_3(%arg0: i32, %arg1: memref<2xi32, #tpu.memory_space<smem>>) -> (i32, i32, i32) {
    %c0_i32 = arith.constant 0 : i32
    %c0_i32_0 = arith.constant 0 : i32
    %c0_i32_1 = arith.constant 0 : i32
    %c0_i32_2 = arith.constant 0 : i32
    return %c0_i32, %c0_i32_0, %c0_i32_1 : i32, i32, i32
  }
  func.func @transform_4(%arg0: i32, %arg1: memref<2xi32, #tpu.memory_space<smem>>) -> (i32, i32, i32) {
    %c0_i32 = arith.constant 0 : i32
    %c0_i32_0 = arith.constant 0 : i32
    %c0_i32_1 = arith.constant 0 : i32
    %c0_i32_2 = arith.constant 0 : i32
    return %c0_i32, %c0_i32_0, %c0_i32_1 : i32, i32, i32
  }
  func.func @transform_5(%arg0: i32, %arg1: memref<2xi32, #tpu.memory_space<smem>>) -> (i32, i32, i32) {
    %c0_i32 = arith.constant 0 : i32
    %c0_i32_0 = arith.constant 0 : i32
    %c0_i32_1 = arith.constant 0 : i32
    %c0_i32_2 = arith.constant 0 : i32
    return %c0_i32, %c0_i32_0, %c0_i32_1 : i32, i32, i32
  }
  func.func @transform_6(%arg0: i32, %arg1: memref<2xi32, #tpu.memory_space<smem>>) -> (i32, i32, i32) {
    %c0_i32 = arith.constant 0 : i32
    %c0_i32_0 = arith.constant 0 : i32
    %c0_i32_1 = arith.constant 0 : i32
    %c0_i32_2 = arith.constant 0 : i32
    return %c0_i32, %c0_i32_0, %c0_i32_1 : i32, i32, i32
  }
  func.func @transform_7(%arg0: i32, %arg1: memref<2xi32, #tpu.memory_space<smem>>) -> (i32, i32, i32) {
    %c0_i32 = arith.constant 0 : i32
    %c0_i32_0 = arith.constant 0 : i32
    %c0_i32_1 = arith.constant 0 : i32
    %c0_i32_2 = arith.constant 0 : i32
    return %c0_i32, %c0_i32_0, %c0_i32_1 : i32, i32, i32
  }
  func.func @transform_8(%arg0: i32, %arg1: memref<2xi32, #tpu.memory_space<smem>>) -> (i32, i32, i32) {
    %c0_i32 = arith.constant 0 : i32
    %c0_i32_0 = arith.constant 0 : i32
    %c0_i32_1 = arith.constant 0 : i32
    %c0_i32_2 = arith.constant 0 : i32
    return %c0_i32, %c0_i32_0, %c0_i32_1 : i32, i32, i32
  }
  func.func @transform_9(%arg0: i32, %arg1: memref<2xi32, #tpu.memory_space<smem>>) -> (i32, i32) {
    %c0_i32 = arith.constant 0 : i32
    %c0_i32_0 = arith.constant 0 : i32
    %c0_i32_1 = arith.constant 0 : i32
    return %c0_i32, %c0_i32_0 : i32, i32
  }
  func.func @transform_10(%arg0: i32, %arg1: memref<2xi32, #tpu.memory_space<smem>>) -> (i32, i32) {
    %c0_i32 = arith.constant 0 : i32
    %c0_i32_0 = arith.constant 0 : i32
    %c0_i32_1 = arith.constant 0 : i32
    return %c0_i32, %c0_i32_0 : i32, i32
  }
  func.func @transform_11(%arg0: i32, %arg1: memref<2xi32, #tpu.memory_space<smem>>) -> (i32, i32) {
    %c0_i32 = arith.constant 0 : i32
    %c0_i32_0 = arith.constant 0 : i32
    %c0_i32_1 = arith.constant 0 : i32
    return %c0_i32, %c0_i32_0 : i32, i32
  }
  func.func @transform_12(%arg0: i32, %arg1: memref<2xi32, #tpu.memory_space<smem>>) -> (i32, i32) {
    %c0_i32 = arith.constant 0 : i32
    %c0_i32_0 = arith.constant 0 : i32
    %c0_i32_1 = arith.constant 0 : i32
    return %c0_i32, %c0_i32_0 : i32, i32
  }
  func.func @transform_13(%arg0: i32, %arg1: memref<2xi32, #tpu.memory_space<smem>>) -> (i32, i32, i32) {
    %c0_i32 = arith.constant 0 : i32
    %c0_i32_0 = arith.constant 0 : i32
    %c0_i32_1 = arith.constant 0 : i32
    return %arg0, %c0_i32, %c0_i32_0 : i32, i32, i32
  }
}

</mosaic_0001>

<bundles_post_ra>
// kernel: tpu_custom_call.1
= control target key start
LH: loop header
LB: loop body
LE: loop exit
PB: predicated region body
PF: predicated region fallthrough
CT: control target
= control target key end

     0   :  { %s3638_s16 = smov [#allocation3]   ;;  %s4538_s0 = inlined_call_operand.hbm [shape: s32[2], index: 0, kind: input, shape index: {}]   ;;  %s4539_s1 = inlined_call_operand.hbm [shape: f32[2,8,64], index: 1, kind: input, shape index: {}]   ;;  %s4540_s2 = inlined_call_operand.hbm [shape: f32[2,1,8], index: 2, kind: input, shape index: {}]   ;;  %s4541_s3 = inlined_call_operand.vmem [shape: f32[2,6,64], index: 3, kind: input, shape index: {}]   ;;  %s4542_s4 = inlined_call_operand.vmem [shape: bf16[2,64,192], index: 4, kind: input, shape index: {}]   ;;  %s4543_s5 = inlined_call_operand.hbm [shape: f32[2,1,192], index: 5, kind: input, shape index: {}]   ;;  %s4544_s6 = inlined_call_operand.hbm [shape: bf16[2,64,64], index: 6, kind: input, shape index: {}]   ;;  %s4545_s7 = inlined_call_operand.vmem [shape: bf16[2,64,256], index: 7, kind: input, shape index: {}]   ;;  %s4546_s8 = inlined_call_operand.hbm [shape: f32[2,1,256], index: 8, kind: input, shape index: {}]   ;;  %s4547_s9 = inlined_call_operand.vmem [shape: bf16[2,256,64], index: 9, kind: input, shape index: {}]   ;;  %s4548_s10 = inlined_call_operand.hbm [shape: f32[2,64], index: 10, kind: input, shape index: {}]   ;;  %s4549_s11 = inlined_call_operand.vmem [shape: bf16[64,64], index: 11, kind: input, shape index: {}]   ;;  %s4550_s12 = inlined_call_operand.vmem [shape: bf16[64,512], index: 12, kind: input, shape index: {}]   ;;  %s4551_s13 = inlined_call_operand.vmem [shape: f32[1,512], index: 13, kind: input, shape index: {}]   ;;  %s4552_s14 = inlined_call_operand.hbm [shape: f32[2,1,512], index: 14, kind: output, shape index: {}]  }
   0x1   :  { %4559 = sst [smem:[#allocation28_spill]] %s4543_s5  ;;  %s20_s15 = sshll.u32 %s4538_s0, 4  ;;  %s21_s15 = int_to_ptr.hbm [resolvable:$true] %s20_s15 }
   0x2   :  { %4560 = sst [smem:[#allocation29_spill]] %s4544_s6 }
   0x3   :  { %4561 = sst [smem:[#allocation30_spill]] %s4546_s8 }
   0x4   :  { %4562 = sst [smem:[#allocation31_spill]] %s4548_s10 }
   0x5   :  { %4563 = sst [smem:[#allocation32_spill]] %s4551_s13 }
   0x6   :  { %4564 = sst [smem:[#allocation33_spill]] %s4552_s14 }
   0x7   :  { %23 = dma.hbm_to_smem %s21_s15, 16, %s3638_s16, [#allocation2] }
   0x8   :  { %3596 = dma.done.wait [#allocation2], 16 }
   0x9   :  { %3597 = vsyncadd [#allocation2], 4294967280 }
   0xa   :  { %26 = sfence }
   0xb   :  { %27 = vsyncpa [#allocation5], 0 }
   0xc   :  { %29 = vsyncpa [#allocation5 + $0x1], 0 }
   0xd   :  { %30 = vsyncpa [#allocation8], 0 }
   0xe   :  { %32 = vsyncpa [#allocation8 + $0x1], 0 }
   0xf   :  { %33 = vsyncpa [#allocation11], 0 }
  0x10   :  { %34 = vsyncpa [#allocation14], 0 }
  0x11   :  { %35 = vsyncpa [#allocation6], 0 }
  0x12   :  { %37 = vsyncpa [#allocation6 + $0x1], 0  ;;  %s3734_s17 = smov 0   ;;  %s3736_s18 = smov 0  }
  0x13   :  { %s3738_s19 = smov 0   ;;  %s3740_s0 = smov 0  }
  0x14 LB: > { %4565 = sst [smem:[#allocation23_spill]] %s3624_s17  ;;  %s3758_s23 = sadd.s32 4294967295, %s3636_s0   ;;  %s3636_s0 = sphi %s3740_s0, %s4586_s0   ;;  %s3632_s19 = sphi %s3738_s19, %s4588_s19   ;;  %s3628_s18 = sphi %s3736_s18, %s4590_s18   ;;  %s3624_s17 = sphi %s3734_s17, %s4589_s17  }
  0x15   : > { %4566 = sst [smem:[#allocation24_spill]] %s3632_s19  ;;  %p2624_p0 = scmp.ge.s32.totalorder %s3636_s0, 1 }
  0x16   : > { %s4567_s5 = sld [smem:[#allocation28_spill]]  ;;  %p64_p1 = scmp.eq.s32.totalorder %s3758_s23, 0 }
  0x17   : > { %p357_p2 = scmp.lt.s32.totalorder %s3636_s0, 3  ;;  %s3639_s25 = smov [#allocation9]  }
  0x18   : > { %s376_s26 = sshll.u32 %s3639_s25, 4  ;;  %s4569_s6 = sld [smem:[#allocation29_spill]]  ;;  %s377_s26 = int_to_ptr.vmem [resolvable:$true] %s376_s26 }
  0x19   : > { %p3763_p3 = pnand %p2624_p0, %p357_p2  ;;  %s3640_s15 = smov [#allocation10]  }
  0x1a   : > { %s390_s16 = sshll.u32 %s3640_s15, 4  ;;  %s3641_s20 = smov 32   ;;  %s391_s16 = int_to_ptr.vmem [resolvable:$true] %s390_s16 }
  0x1b   : > { %p3216_p4 = pneg %p3763_p3  ;;  %s3642_s21 = smov 2  }
  0x1c   : > { %s374_s22 = sshll.u32 %s4567_s5, 4  ;;  %s3643_s25 = smov 64   ;;  %s375_s22 = int_to_ptr.hbm [resolvable:$true] %s374_s22 }
  0x1d   : > { %p3775_p6 = pnand %p3216_p4, %p64_p1  ;;  %s3644_s27 = smov 4  }
  0x1e   : > { %s388_s29 = sshll.u32 %s4569_s6, 4  ;;  %s4571_s8 = sld [smem:[#allocation30_spill]]  ;;  %s389_s29 = int_to_ptr.hbm [resolvable:$true] %s388_s29 }
  0x1f   : > { %3219 = dma.hbm_to_vmem [thread:$0]  (!%p3775_p6), %s375_s22, 64, %s377_s26, [#allocation8], %s3641_s20, %s3641_s20, %s3642_s21  }
  0x20   : > { %3222 = dma.hbm_to_vmem [thread:$0]  (!%p3775_p6), %s389_s29, 1024, %s391_s16, [#allocation11], %s3643_s25, %s3643_s25, %s3644_s27  }
  0x21   : > { %s3645_s15 = smov [#allocation12]   ;;  %s4572_s10 = sld [smem:[#allocation31_spill]] }
  0x22   : > { %s407_s22 = sshll.u32 %s3645_s15, 4  ;;  %s3646_s5 = smov [#allocation13]   ;;  %s408_s22 = int_to_ptr.vmem [resolvable:$true] %s407_s22 }
  0x23   : > { %s425_s29 = sshll.u32 %s3646_s5, 4  ;;  %s2623_s16 = sadd.s32 4294967294, %s3636_s0   ;;  %s426_s29 = int_to_ptr.vmem [resolvable:$true] %s425_s29 }
  0x24   : > { %s405_s6 = sshll.u32 %s4571_s8, 4  ;;  %s3795_s25 = sadd.s32 1, %s3636_s0   ;;  %s406_s6 = int_to_ptr.hbm [resolvable:$true] %s405_s6 }
  0x25   : > { %3225 = dma.hbm_to_vmem [thread:$0]  (!%p3775_p6), %s406_s6, 64, %s408_s22, [#allocation11], %s3641_s20, %s3641_s20, %s3642_s21  }
  0x26   : > { %4573 = sst [smem:[#allocation25_spill]] %s3795_s25  ;;  %s47_s27 = ssub.s32 %s3636_s0, %s3795_s25 }
  0x27   : > { %s423_s13 = sshll.u32 %s4572_s10, 4  ;;  %s50_s14 = sadd.s32 1, %s3632_s19  ;;  %s424_s13 = int_to_ptr.hbm [resolvable:$true] %s423_s13 }
  0x28   : > { %3228 = dma.hbm_to_vmem [thread:$0]  (!%p3775_p6), %s424_s13, 32, %s426_s29, [#allocation14]  }
  0x29   : > { %p48_p7 = scmp.eq.s32.totalorder %s47_s27, 0  ;;  %p57_p8 = scmp.ne.s32.totalorder %s3632_s19, %s3628_s18 }
  0x2a   : > { %p58_p9 = scmp.eq.s32.totalorder %s3636_s0, 0  ;;  %p63_p10 = scmp.ne.s32.totalorder %s3628_s18, %s3624_s17 }
  0x2b   : > { %s3806_s6 = scalar_select %p48_p7, %s3632_s19, %s50_s14  }
  0x2c   : > { %p3808_p11 = por %p58_p9, %p57_p8  ;;  %p3814_p12 = por %p64_p1, %p63_p10 }
  0x2d   : > { %4574 = sst [smem:[#allocation26_spill]] %s3806_s6  ;;  %p344_p13 = scmp.eq.s32.totalorder %s3758_s23, 1 }
  0x2e   : > { %p350_p0 = scmp.eq.s32.totalorder %s2623_s16, 1  ;;  %p3244_p2 = scmp.lt.s32.totalorder %s3636_s0, 2 }
  0x2f   : > { %s3821_s30 = sand.u32 1, %s3632_s19   ;;  %p3823_p4 = por %p344_p13, %p57_p8 }
  0x30   : > { %p3827_p6 = por %p350_p0, %p63_p10  ;;  %s2630_s15 = sshll.u32 %s3821_s30, 3 }
  0x31   : > { %s2631_s22 = sshll.u32 %s3636_s0, 3  ;;  %s449_s16 = scalar_lea.vmem [#allocation4], %s2630_s15 }
  0x32   : > { %s4578_s28 = scalar_select %p3827_p6, 1, 0 }
  0x33   : > { %s453_s29 = scalar_lea.hbm %s4539_s1, %s2631_s22  ;;  %s457_s27 = sshll.u32 %s449_s16, 4  ;;  %s458_s27 = int_to_ptr.vmem [resolvable:$true] %s457_s27 }
  0x34   : > { %4579 = sst [smem:[#allocation27_spill]] %s4578_s28  ;;  %s455_s14 = sshll.u32 %s453_s29, 4  ;;  %s456_s14 = int_to_ptr.hbm [resolvable:$true] %s455_s14 }
  0x35   : > { %p3838_p7 = pnand %p3244_p2, %p3808_p11  ;;  %s464_s10 = sand.u32 1, %s3636_s0  }
  0x36   : > { %s446_s6 = scalar_lea.sflag [#allocation5], %s3821_s30  ;;  %s3492_s19 = sshra.s32 %s456_s14, 4  ;;  %s3493_s19 = int_to_ptr.hbm [resolvable:$true] %s3492_s19 }
  0x37   : > { %s3494_s25 = scalar_lea.hbm %s3493_s19, 8  ;;  %p3496_p9 = pneg %p3838_p7 }
  0x38   : > { %p3495_p8 = scmp.ne.s32.totalorder %s3493_s19, %s3494_s25  ;;  %s3499_s22 = scalar_lea.hbm %s4539_s1, 16 }
  0x39   : > { %p3500_p11 = scmp.lt.s32.totalorder %s3493_s19, %s4539_s1  ;;  %p3501_p0 = scmp.lt.s32.totalorder %s3499_s22, %s3494_s25 }
  0x3a   : > { %p3497_p10 = pnand %p3496_p9, %p3495_p8 }
  0x3b   : > { %p3502_p2 = por %p3501_p0, %p3500_p11 }
  0x3c   : > { %p3498_p13 = pneg %p3497_p10 }
  0x3e   : > { %p3503_p5 = pnand %p3502_p2, %p3498_p13 }
  0x40   : > { %3506 = shalt.err (!%p3503_p5)
}
  0x41   : > { %3232 = dma.hbm_to_vmem [thread:$0]  (!%p3838_p7), %s456_s14, 128, %s458_s27, %s446_s6  }
  0x42   : > { %s470_s28 = scalar_lea.hbm %s4540_s2, %s3636_s0  ;;  %s467_s15 = scalar_lea.vmem [#allocation7], %s3821_s30 }
  0x43   : > { %s474_s20 = sshll.u32 %s467_s15, 4  ;;  %s472_s17 = sshll.u32 %s470_s28, 4  ;;  %s475_s20 = int_to_ptr.vmem [resolvable:$true] %s474_s20  ;;  %s473_s17 = int_to_ptr.hbm [resolvable:$true] %s472_s17 }
  0x44   : > { %s465_s19 = scalar_lea.sflag [#allocation8], %s464_s10  ;;  %s3522_s25 = sshra.s32 %s473_s17, 4  ;;  %s3523_s25 = int_to_ptr.hbm [resolvable:$true] %s3522_s25 }
  0x45   : > { %s3524_s22 = scalar_lea.hbm %s3523_s25, 1  ;;  %s3529_s27 = scalar_lea.hbm %s4540_s2, 2 }
  0x46   : > { %p3525_p5 = scmp.ne.s32.totalorder %s3523_s25, %s3524_s22  ;;  %p3530_p13 = scmp.lt.s32.totalorder %s3523_s25, %s4540_s2 }
  0x47   : > { %p3531_p11 = scmp.lt.s32.totalorder %s3529_s27, %s3524_s22 }
  0x48   : > { %p3527_p8 = pnand %p3525_p5, %p3496_p9 }
  0x49   : > { %p3532_p0 = por %p3531_p11, %p3530_p13 }
  0x4a   : > { %p3528_p10 = pneg %p3527_p8 }
  0x4c   : > { %p3533_p2 = pnand %p3532_p0, %p3528_p10 }
  0x4e   : > { %3536 = shalt.err (!%p3533_p2)
}
  0x4f   : > { %3235 = dma.hbm_to_vmem [thread:$0]  (!%p3838_p7), %s473_s17, 16, %s475_s20, %s465_s19  }
  0x50   : > { %483 = sbr.rel (%p3763_p3) target bundleno = 5262 (0x148e), region = 72  ;;  %s3876_s10 = sand.u32 (!%p3763_p3), 1, %s3628_s18  }
  0x51   : > { %s2633_s30 = sshll.u32 (!%p3763_p3), %s3876_s10, 3  ;;  %s486_s28 = scalar_lea.sflag (!%p3763_p3), [#allocation5], %s3876_s10 }
  0x52   : > { %s489_s29 = scalar_lea.vmem (!%p3763_p3), [#allocation4], %s2633_s30 }
  0x55   : > { %3599 = dma.done.wait (%p3814_p12), %s486_s28, 128  }
  0x56   : > { %3601 = vsyncadd (%p3814_p12), %s486_s28, 4294967168  ;;  %s495_s8 = sand.u32 1, %s3758_s23   ;;  %s498_s24 = scalar_lea.vmem [#allocation7], %s3876_s10 }
  0x57   : > { %s496_s17 = scalar_lea.sflag [#allocation8], %s495_s8 }
  0x58   : > { %3603 = dma.done.wait (%p3814_p12), %s496_s17, 16  }
  0x59   : > { %3605 = vsyncadd (%p3814_p12), %s496_s17, 4294967280 }
  0x5a   : > { %3607 = dma.done.wait (%p64_p1), [#allocation8], 64  }
  0x5b   : > { %3609 = vsyncadd (%p64_p1), [#allocation8], 4294967232 }
  0x5c   : > { %3611 = dma.done.wait (%p64_p1), [#allocation11], 1088  }
  0x5d   : > { %3613 = vsyncadd (%p64_p1), [#allocation11], 4294966208 }
  0x5e   : > { %3615 = dma.done.wait (%p64_p1), [#allocation14], 32  }
  0x5f   : > { %3617 = vsyncadd (%p64_p1), [#allocation14], 4294967264  ;;  %vm590_vm0 = vcmask 523264   ;;  %v3902_v0 = vld [vmem:[%s489_s29] sm:$0xff]  ;;  %v3647_v2 = vmov 64.0   ;;  %vm764_vm5 = vcmask 1043456  }
  0x60   : > { %v591_v1 = vsel %vm590_vm0, %v3902_v0, 0.0  ;;  %3300 = vrcp.f32 %v3647_v2  ;;  %v2665_v14 = vld [vmem:[%s4542_s4 + $0x30] sm:$0xf]  ;;  %v3113_v15 = vld [vmem:[%s4542_s4 + $0x34] sm:$0xf0]  ;;  %s3648_s13 = smov 64  }
  0x61   : > { %592 = vadd.xlane.f32.xlu0 %v591_v1  ;;  %v3112_v16 = vld [vmem:[%s4542_s4 + $0x34] sm:$0xf]  ;;  %v2666_v17 = vor.u32 %v3113_v15, %v2665_v14  ;;  %v2667_v18 = vld [vmem:[%s4542_s4 + $0x38] sm:$0xf0]  ;;  %v2657_v20 = vld [vmem:[%s4542_s4 + $0x20] sm:$0xf]  ;;  %v568_v14 = vlaneseq }
  0x62   : > { %v2670_v19 = vor.u32 %v3112_v16, %v2667_v18  ;;  %v3111_v21 = vld [vmem:[%s4542_s4 + $0x24] sm:$0xf0]  ;;  %v3110_v22 = vld [vmem:[%s4542_s4 + $0x24] sm:$0xf]  ;;  %v2659_v24 = vld [vmem:[%s4542_s4 + $0x28] sm:$0xf0] }
  0x63   : > { %686 = vmatpush.bf16.msra.mxu0 %v2666_v17  ;;  %v2658_v23 = vor.u32 %v3111_v21, %v2657_v20  ;;  %v2662_v25 = vor.u32 %v3110_v22, %v2659_v24  ;;  %v2649_v26 = vld [vmem:[%s4542_s4 + $0x10] sm:$0xf]  ;;  %v3109_v27 = vld [vmem:[%s4542_s4 + $0x14] sm:$0xf0]  ;;  %v3108_v28 = vld [vmem:[%s4542_s4 + $0x14] sm:$0xf] }
  0x64   : > { %699 = vmatpush.bf16.msra.mxu1 %v2670_v19  ;;  %v2650_v29 = vor.u32 %v3109_v27, %v2649_v26  ;;  %v2651_v30 = vld [vmem:[%s4542_s4 + $0x18] sm:$0xf0]  ;;  %v2641_v31 = vld [vmem:[%s4542_s4] sm:$0xf]  ;;  %v3107_v32 = vld [vmem:[%s4542_s4 + $0x4] sm:$0xf0] }
  0x65   : > { %v2654_v33 = vor.u32 %v3108_v28, %v2651_v30  ;;  %v3106_v34 = vld [vmem:[%s4542_s4 + $0x4] sm:$0xf]  ;;  %v2643_v35 = vld [vmem:[%s4542_s4 + $0x8] sm:$0xf0]  ;;  %v2642_v36 = vor.u32 %v3107_v32, %v2641_v31  ;;  %v633_v55 = vld [vmem:[#allocation9] sm:$0x3] }
  0x66   : > { %v3301_v3 = vpop.eup %3300  ;;  %v2646_v37 = vor.u32 %v3106_v34, %v2643_v35  ;;  %v3963_v46 = vld [vmem:[%s4541_s3] sm:$0x3f]  ;;  %v635_v56 = vperm.slane %v633_v55, 0  ;;  %v636_v57 = vperm.slane %v633_v55, 1  ;;  %s3649_s16 = smov 112   ;;  %s3650_s15 = smov 16  }
  0x67   : > { %v595_v4 = vmul.f32 64.0, %v3301_v3  ;;  %vm599_vm1 = vweird.f32 %v3301_v3  ;;  %687 = vmatpush.bf16.msra.mxu0 %v2658_v23  ;;  %v620_v48 = vperm.slane %v3963_v46, 0  ;;  %v622_v51 = vperm.slane %v3963_v46, 1  ;;  %s3651_s20 = smov 80   ;;  %s3654_s19 = smov 32  }
  0x68   : > { %700 = vmatpush.bf16.msra.mxu1 %v2662_v25  ;;  %vm714_vm6 = vcmask 130048   ;;  %v3983_v16 = vshrl.u32 %v568_v14, 7  ;;  %v571_v17 = vand.u32 127, %v568_v14  ;;  %v3652_v20 = vmov 0.0   ;;  %s3655_s25 = smov 96   ;;  %s2209_s6 = sld [smem:[#allocation3 + %s3758_s23]] }
  0x69   : > { %v596_v5 = vsub.f32 1.0, %v595_v4  ;;  %vm734_vm8 = vcmask 64512   ;;  %s4581_s5 = sld [smem:[#allocation32_spill]]  ;;  %s2638_s30 = sshll.u32 %s3876_s10, 2 }
  0x6a   : > { %vm572_vm7 = vcmp.gt.s32.totalorder %v571_v17, %v3983_v16  ;;  %s3099_s28 = sshll.u32 %s3758_s23, 2  ;;  %s2481_s23 = scalar_lea.sflag [#allocation6], %s3876_s10 }
  0x6b   : > { %v597_v6 = vmul.f32 %v3301_v3, %v596_v5  ;;  %688 = vmatpush.bf16.msra.mxu0 %v2650_v29  ;;  %v573_v21 = vsel %vm572_vm7, -1e+09, %v3652_v20 }
  0x6c   : > { %701 = vmatpush.bf16.msra.mxu1 %v2654_v33 }
  0x6d   : > { %v598_v7 = vadd.f32 %v3301_v3, %v597_v6  ;;  %v3102_v6 = vld [vmem:[#allocation10] sm:$0xff] }
  0x6f   : > { %v3906_v8 = vsel %vm599_vm1, %v3301_v3, %v598_v7  ;;  %689 = vmatpush.bf16.msra.mxu0 %v2642_v36 }
  0x70   : > { %702 = vmatpush.bf16.msra.mxu1 %v2646_v37 }
  0x74   : > { %892 = vmatpush.bf16.msrb.mxu1 %v3102_v6 }
  0xd4   : > { %v593_v9 = vpop.xlane.xlu0 %592 }
  0xd5   : > { %v601_v10 = vmul.f32 %v3906_v8, %v593_v9 }
  0xd7   : > { %v602_v11 = vsub.f32 %v3902_v0, %v601_v10 }
  0xd9   : > { %v603_v12 = vmul.f32 %v602_v11, %v602_v11 }
  0xdb   : > { %v604_v13 = vsel %vm590_vm0, %v603_v12, 0.0 }
  0xdc   : > { %605 = vadd.xlane.f32.xlu0 %v604_v13  ;;  %v574_v13 = vld [vmem:[%s498_s24] sm:$0x1]  ;;  %s3653_s24 = smov 48  }
  0xdd   : > { %v575_v15 = vsub.f32 1.0, %v574_v13 }
  0xdf   : > { %v576_v18 = vmul.f32 -1e+09, %v575_v15 }
  0xe1   : > { %v578_v19 = vperm.slane %v576_v18, 0 }
  0xe3   : > { %v3988_v22 = vadd.f32 %v578_v19, %v573_v21 }
 0x14f   : > { %v606_v38 = vpop.xlane.xlu0 %605 }
 0x150   : > { %v607_v39 = vmul.f32 %v606_v38, %v3906_v8 }
 0x152   : > { %v608_v40 = vadd.f32 1e-05, %v607_v39 }
 0x154   : > { %3302 = vrsqrt.f32 %v608_v40  ;;  %vm615_vm3 = vweird.f32 %v608_v40 }
 0x15a   : > { %v3303_v41 = vpop.eup %3302 }
 0x15b   : > { %v610_v42 = vmul.f32 %v3303_v41, %v608_v40  ;;  %vm616_vm2 = vweird.f32 %v3303_v41 }
 0x15c   : > { %vm617_vm4 = vmor %vm615_vm3, %vm616_vm2 }
 0x15d   : > { %v611_v43 = vmul.f32 %v3303_v41, %v610_v42 }
 0x15f   : > { %v612_v44 = vmul.f32 0.5, %v611_v43 }
 0x161   : > { %v613_v45 = vsub.f32 1.5, %v612_v44 }
 0x163   : > { %v614_v47 = vmul.f32 %v3303_v41, %v613_v45 }
 0x165   : > { %v618_v49 = vsel %vm617_vm4, %v3303_v41, %v614_v47 }
 0x166   : > { %v619_v50 = vmul.f32 %v618_v49, %v602_v11 }
 0x168   : > { %v621_v52 = vmul.f32 %v620_v48, %v619_v50 }
 0x16a   : > { %v623_v53 = vadd.f32 %v622_v51, %v621_v52 }
 0x16c   : > { %v624_v54 = vpack.c.bf16 %v623_v53, %v623_v53 }
 0x16e   : > { %2671 = vmatmul.msk.bf16.vlgmr.msra.gmra.mxu0 %vm590_vm0, %v624_v54  ;;  %2672 = vmatmul.msk.bf16.vlgmr.msra.gmra.mxu1 %vm590_vm0, %v624_v54 }
 0x1eb   : > { %v691_v58 = vpop.f32.mrf.mxu0  ;;  %v704_v59 = vpop.f32.mrf.mxu1 }
 0x1ec   : > { %v692_v60 = vadd.f32 %v691_v58, %v635_v56  ;;  %v705_v61 = vadd.f32 %v704_v59, %v636_v57 }
 0x1ee   : > { %v708_v62 = vmul.f32 0.25, %v692_v60  ;;  %v710_v63 = vpack.c.bf16 %v692_v60, %v692_v60  ;;  %v3969_v1 = vpack.c.bf16 %v705_v61, %v705_v61 }
 0x1f0   : > { %v709_v2 = vpack.c.bf16 %v708_v62, %v708_v62  ;;  %712 = vrot.lane.b32.xlu1 %v710_v63, %s3648_s13  ;;  %v766_v3 = vsel %vm764_vm5, %v3969_v1, 0 }
 0x1f1   : > { %775 = vmatpush.bf16.msra.mxu3 %v766_v3 }
 0x1f2   : > { %783 = vrot.lane.b32.xlu0 %v709_v2, %s3649_s16 }
 0x1f3   : > { %v693_v4 = vpop.f32.mrf.mxu0  ;;  %v706_v5 = vpop.f32.mrf.mxu1 }
 0x1fa   : > { %993 = vrot.lane.b32.xlu0 %v710_v63, %s3650_s15 }
 0x202   : > { %991 = vrot.lane.b32.xlu0 %v709_v2, %s3651_s20 }
 0x262   : > { %v713_v7 = vpop.permute.xlu1 %712 }
 0x263   : > { %v719_v9 = vsel %vm714_vm6, %v713_v7, 0 }
 0x264   : > { %728 = vmatpush.bf16.xpose.msra.mxu2 %v719_v9  ;;  %v784_v10 = vpop.permute.xlu0 %783 }
 0x26b   : > { %2673 = vmatmul.msk.bf16.vlgmr.msra.gmra.mxu2 %vm714_vm6, %v709_v2 }
 0x26c   : > { %v994_v11 = vpop.permute.xlu0 %993 }
 0x26d   : > { %v999_v12 = vsel %vm714_vm6, %v994_v11, 0 }
 0x26e   : > { %1008 = vmatpush.bf16.xpose.msra.mxu1 %v999_v12 }
 0x274   : > { %v992_v56 = vpop.permute.xlu0 %991 }
 0x2ee   : > { %v730_v23 = vpop.f32.mrf.mxu2 }
 0x2ef   : > { %v731_v24 = vadd.f32 %v730_v23, %v3988_v22 }
 0x2f1   : > { %v735_v25 = vsel %vm734_vm8, %v731_v24, -inf }
 0x2f2   : > { %736 = vmax.xlane.f32.xlu1 %v735_v25 }
 0x2f6   : > { %v732_v26 = vpop.f32.mrf.mxu2 }
 0x365   : > { %v737_v27 = vpop.xlane.xlu1 %736 }
 0x366   : > { %v738_v28 = vsub.f32 %v731_v24, %v737_v27 }
 0x368   : > { %v739_v29 = vmul.f32 1.442695, %v738_v28 }
 0x36a   : > { %3304 = vpow2.f32 %v739_v29 }
 0x370   : > { %v3305_v30 = vpop.eup %3304 }
 0x371   : > { %v741_v31 = vsel %vm734_vm8, %v3305_v30, 0.0 }
 0x372   : > { %742 = vadd.xlane.f32.xlu2 %v741_v31 }
 0x38a   : > { %785 = vrot.lane.b32.xlu2 %v710_v63, %s3653_s24 }
 0x392   : > { %900 = vrot.lane.b32.xlu2 %v710_v63, %s3654_s19 }
 0x39a   : > { %898 = vrot.lane.b32.xlu2 %v709_v2, %s3655_s25 }
 0x3e5   : > { %v743_v32 = vpop.xlane.xlu2 %742 }
 0x3e6   : > { %3306 = vrcp.f32 %v743_v32  ;;  %v755_v38 = vand.u32 2147483648, %v743_v32  ;;  %v753_v40 = vand.u32 2147483647, %v743_v32  ;;  %vm749_vm10 = vweird.f32 %v743_v32 }
 0x3e8   : > { %v756_v42 = vor.u32 1.1754944e-38, %v755_v38  ;;  %vm754_vm12 = vcmp.eq.f32.partialorder %v753_v40, 8.507059e+37 }
 0x3ec   : > { %v3307_v33 = vpop.eup %3306 }
 0x3ed   : > { %v745_v34 = vmul.f32 %v3307_v33, %v743_v32  ;;  %v786_v35 = vpop.permute.xlu2 %785  ;;  %vm750_vm9 = vweird.f32 %v3307_v33 }
 0x3ee   : > { %v791_v36 = vsel %vm714_vm6, %v786_v35, 0  ;;  %vm751_vm11 = vmor %vm749_vm10, %vm750_vm9 }
 0x3ef   : > { %v746_v37 = vsub.f32 1.0, %v745_v34  ;;  %800 = vmatpush.bf16.xpose.msrb.mxu3 %v791_v36 }
 0x3f1   : > { %v747_v39 = vmul.f32 %v3307_v33, %v746_v37 }
 0x3f3   : > { %v748_v41 = vadd.f32 %v3307_v33, %v747_v39 }
 0x3f5   : > { %v752_v43 = vsel %vm751_vm11, %v3307_v33, %v748_v41  ;;  %v901_v47 = vpop.permute.xlu2 %900 }
 0x3f6   : > { %v757_v44 = vsel %vm754_vm12, %v756_v42, %v752_v43  ;;  %v906_v49 = vsel %vm714_vm6, %v901_v47, 0 }
 0x3f7   : > { %v758_v45 = vmul.f32 %v3305_v30, %v757_v44 }
 0x3f9   : > { %v759_v48 = vpack.c.bf16 %v758_v45, %v758_v45 }
 0x3fb   : > { %2674 = vmatmul.msk.bf16.vlgmr.msra.gmra.mxu3 %vm734_vm8, %v759_v48 }
 0x3fc   : > { %915 = vmatpush.bf16.xpose.msra.mxu3 %v906_v49 }
 0x3fd   : > { %v899_v50 = vpop.permute.xlu2 %898 }
 0x40b   : > { %2675 = vmatmul.msk.bf16.vlgmr.msrb.gmra.mxu3 %vm714_vm6, %v784_v10 }
 0x41b   : > { %2687 = vmatmul.msk.bf16.vlgmr.msra.gmra.mxu3 %vm714_vm6, %v899_v50 }
 0x47e   : > { %v777_v51 = vpop.f32.mrf.mxu3 }
 0x47f   : > { %v781_v52 = vpack.c.bf16 %v777_v51, %v777_v51 }
 0x481   : > { %2686 = vmatmul.msk.bf16.vlgmr.msrb.gmra.mxu1 %vm714_vm6, %v781_v52 }
 0x486   : > { %v779_v53 = vpop.f32.mrf.mxu3 }
 0x48e   : > { %v802_v54 = vpop.f32.mrf.mxu3 }
 0x48f   : > { %v803_v55 = vadd.f32 %v802_v54, %v3988_v22 }
 0x491   : > { %2694 = vmatmul.msk.bf16.vlgmr.msra.gmra.mxu1 %vm714_vm6, %v992_v56  ;;  %v806_v57 = vsel %vm734_vm8, %v803_v55, -inf }
 0x492   : > { %807 = vmax.xlane.f32.xlu2 %v806_v57 }
 0x496   : > { %v804_v58 = vpop.f32.mrf.mxu3 }
 0x49e   : > { %v917_v59 = vpop.f32.mrf.mxu3 }
 0x49f   : > { %v918_v60 = vadd.f32 %v917_v59, %v3988_v22 }
 0x4a1   : > { %v921_v61 = vsel %vm734_vm8, %v918_v60, -inf }
 0x4a2   : > { %922 = vmax.xlane.f32.xlu0 %v921_v61 }
 0x4a6   : > { %v919_v62 = vpop.f32.mrf.mxu3 }
 0x4aa   : > { %1039 = vrot.lane.b32.xlu2 %v3969_v1, %s3651_s20 }
 0x4b6   : > { %946 = vrot.lane.b32.xlu0 %v3969_v1, %s3655_s25 }
 0x4fe   : > { %v4011_v63 = vpop.f32.mrf.mxu1 }
 0x505   : > { %v808_v2 = vpop.xlane.xlu2 %807 }
 0x506   : > { %v896_v3 = vpop.f32.mrf.mxu1  ;;  %v809_v4 = vsub.f32 %v803_v55, %v808_v2 }
 0x508   : > { %v810_v5 = vmul.f32 1.442695, %v809_v4 }
 0x50a   : > { %3308 = vpow2.f32 %v810_v5 }
 0x50d   : > { %v1040_v6 = vpop.permute.xlu2 %1039 }
 0x50e   : > { %v1045_v7 = vsel %vm764_vm5, %v1040_v6, 0  ;;  %v1010_v9 = vpop.f32.mrf.mxu1 }
 0x50f   : > { %v1011_v10 = vadd.f32 %v1010_v9, %v3988_v22  ;;  %1054 = vmatpush.bf16.msrb.mxu3 %v1045_v7 }
 0x510   : > { %v3309_v13 = vpop.eup %3308 }
 0x511   : > { %v1014_v11 = vsel %vm734_vm8, %v1011_v10, -inf  ;;  %v812_v19 = vsel %vm734_vm8, %v3309_v13, 0.0 }
 0x512   : > { %1015 = vmax.xlane.f32.xlu1 %v1014_v11 }
 0x515   : > { %v923_v12 = vpop.xlane.xlu0 %922 }
 0x516   : > { %v924_v15 = vsub.f32 %v918_v60, %v923_v12  ;;  %v1012_v17 = vpop.f32.mrf.mxu1  ;;  %v3105_v12 = vld [vmem:[#allocation10 + $0x18] sm:$0xff] }
 0x518   : > { %v925_v18 = vmul.f32 1.442695, %v924_v15  ;;  %v3104_v15 = vld [vmem:[#allocation10 + $0x10] sm:$0xff] }
 0x51a   : > { %3310 = vpow2.f32 %v925_v18  ;;  %813 = vadd.xlane.f32.xlu1 %v812_v19 }
 0x520   : > { %v4017_v21 = vpop.eup %3310 }
 0x521   : > { %v927_v23 = vsel %vm734_vm8, %v4017_v21, 0.0 }
 0x522   : > { %928 = vadd.xlane.f32.xlu1 %v927_v23 }
 0x528   : > { %v947_v57 = vpop.permute.xlu0 %946 }
 0x529   : > { %v952_v62 = vsel %vm764_vm5, %v947_v57, 0  ;;  %v3117_v57 = vld [vmem:[%s4545_s7 + $0x14] sm:$0xf0] }
 0x585   : > { %v1016_v24 = vpop.xlane.xlu1 %1015 }
 0x586   : > { %v1017_v25 = vsub.f32 %v1011_v10, %v1016_v24 }
 0x588   : > { %v1018_v26 = vmul.f32 1.442695, %v1017_v25 }
 0x58a   : > { %3312 = vpow2.f32 %v1018_v26 }
 0x58d   : > { %v814_v29 = vpop.xlane.xlu1 %813 }
 0x58e   : > { %3314 = vrcp.f32 %v814_v29  ;;  %v826_v43 = vand.u32 2147483648, %v814_v29  ;;  %vm820_vm1 = vweird.f32 %v814_v29  ;;  %v824_v45 = vand.u32 2147483647, %v814_v29 }
 0x590   : > { %v3313_v27 = vpop.eup %3312  ;;  %v827_v52 = vor.u32 1.1754944e-38, %v826_v43  ;;  %vm825_vm7 = vcmp.eq.f32.partialorder %v824_v45, 8.507059e+37  ;;  %v3120_v45 = vld [vmem:[%s4545_s7 + $0x34] sm:$0xf] }
 0x591   : > { %v1020_v28 = vsel %vm734_vm8, %v3313_v27, 0.0 }
 0x592   : > { %1021 = vadd.xlane.f32.xlu1 %v1020_v28 }
 0x594   : > { %v3315_v31 = vpop.eup %3314 }
 0x595   : > { %v929_v30 = vpop.xlane.xlu1 %928  ;;  %v816_v33 = vmul.f32 %v3315_v31, %v814_v29  ;;  %vm821_vm14 = vweird.f32 %v3315_v31 }
 0x596   : > { %vm822_vm3 = vmor %vm820_vm1, %vm821_vm14  ;;  %v941_v4 = vand.u32 2147483648, %v929_v30  ;;  %vm935_vm10 = vweird.f32 %v929_v30  ;;  %v939_v5 = vand.u32 2147483647, %v929_v30 }
 0x597   : > { %v817_v34 = vsub.f32 1.0, %v816_v33 }
 0x598   : > { %v942_v7 = vor.u32 1.1754944e-38, %v941_v4  ;;  %vm940_vm12 = vcmp.eq.f32.partialorder %v939_v5, 8.507059e+37  ;;  %v2705_v5 = vld [vmem:[%s4545_s7 + $0x8] sm:$0xf0] }
 0x599   : > { %v818_v37 = vmul.f32 %v3315_v31, %v817_v34 }
 0x59b   : > { %v819_v42 = vadd.f32 %v3315_v31, %v818_v37 }
 0x59d   : > { %v823_v51 = vsel %vm822_vm3, %v3315_v31, %v819_v42 }
 0x59e   : > { %v828_v55 = vsel %vm825_vm7, %v827_v52, %v823_v51  ;;  %v3119_v51 = vld [vmem:[%s4545_s7 + $0x24] sm:$0xf0]  ;;  %v3118_v52 = vld [vmem:[%s4545_s7 + $0x24] sm:$0xf] }
 0x59f   : > { %v829_v58 = vmul.f32 %v3309_v13, %v828_v55  ;;  %v3103_v13 = vld [vmem:[#allocation10 + $0x8] sm:$0xff] }
 0x5a0   : > { %870 = vmatpush.bf16.msrb.mxu0 %v3103_v13 }
 0x5a1   : > { %v830_v2 = vpack.c.bf16 %v829_v58, %v829_v58  ;;  %v3116_v58 = vld [vmem:[%s4545_s7 + $0x14] sm:$0xf] }
 0x5a4   : > { %984 = vmatpush.bf16.msra.mxu0 %v3104_v15 }
 0x5ab   : > { %832 = vrot.lane.b32.xlu1 %v3969_v1, %s3649_s16 }
 0x605   : > { %v1022_v32 = vpop.xlane.xlu1 %1021 }
 0x606   : > { %3316 = vrcp.f32 %v1022_v32  ;;  %v1034_v39 = vand.u32 2147483648, %v1022_v32  ;;  %v1032_v41 = vand.u32 2147483647, %v1022_v32  ;;  %vm1028_vm15 = vweird.f32 %v1022_v32 }
 0x607   : > { %3318 = vrcp.f32 %v929_v30 }
 0x608   : > { %v1035_v47 = vor.u32 1.1754944e-38, %v1034_v39  ;;  %vm1033_vm4 = vcmp.eq.f32.partialorder %v1032_v41, 8.507059e+37 }
 0x60c   : > { %v3317_v35 = vpop.eup %3316 }
 0x60d   : > { %v1024_v36 = vmul.f32 %v3317_v35, %v1022_v32  ;;  %vm1029_vm13 = vweird.f32 %v3317_v35  ;;  %v3319_v1 = vpop.eup %3318 }
 0x60e   : > { %vm1030_vm2 = vmor %vm1028_vm15, %vm1029_vm13  ;;  %v931_v49 = vmul.f32 %v3319_v1, %v929_v30  ;;  %vm936_vm9 = vweird.f32 %v3319_v1 }
 0x60f   : > { %v1025_v38 = vsub.f32 1.0, %v1024_v36  ;;  %vm937_vm11 = vmor %vm935_vm10, %vm936_vm9  ;;  %v1085_v36 = vperm.slane %v3963_v46, 4 }
 0x610   : > { %v932_v56 = vsub.f32 1.0, %v931_v49 }
 0x611   : > { %v1026_v40 = vmul.f32 %v3317_v35, %v1025_v38 }
 0x612   : > { %v933_v60 = vmul.f32 %v3319_v1, %v932_v56  ;;  %v2711_v56 = vld [vmem:[%s4545_s7 + $0x10] sm:$0xf] }
 0x613   : > { %v1027_v44 = vadd.f32 %v3317_v35, %v1026_v40 }
 0x614   : > { %v934_v3 = vadd.f32 %v3319_v1, %v933_v60  ;;  %v2713_v60 = vld [vmem:[%s4545_s7 + $0x18] sm:$0xf0] }
 0x615   : > { %v1031_v48 = vsel %vm1030_vm2, %v3317_v35, %v1027_v44  ;;  %v3121_v44 = vld [vmem:[%s4545_s7 + $0x34] sm:$0xf0] }
 0x616   : > { %v1036_v50 = vsel %vm1033_vm4, %v1035_v47, %v1031_v48  ;;  %v938_v6 = vsel %vm937_vm11, %v3319_v1, %v934_v3  ;;  %v2729_v48 = vld [vmem:[%s4545_s7 + $0x38] sm:$0xf0]  ;;  %v3114_v3 = vld [vmem:[%s4545_s7 + $0x4] sm:$0xf] }
 0x617   : > { %v1037_v53 = vmul.f32 %v3313_v27, %v1036_v50  ;;  %v943_v9 = vsel %vm940_vm12, %v942_v7, %v938_v6  ;;  %v2732_v49 = vor.u32 %v3120_v45, %v2729_v48  ;;  %v2719_v50 = vld [vmem:[%s4545_s7 + $0x20] sm:$0xf]  ;;  %v2708_v6 = vor.u32 %v3114_v3, %v2705_v5 }
 0x618   : > { %v944_v10 = vmul.f32 %v4017_v21, %v943_v9  ;;  %v3122_v48 = vld [vmem:[%s4547_s9] sm:$0xff] }
 0x619   : > { %v1038_v54 = vpack.c.bf16 %v1037_v53, %v1037_v53  ;;  %1188 = vmatpush.bf16.msrb.mxu1 %v2732_v49  ;;  %v2720_v53 = vor.u32 %v3119_v51, %v2719_v50  ;;  %v3130_v49 = vld [vmem:[%s4547_s9 + $0x40] sm:$0xff] }
 0x61a   : > { %v945_v11 = vpack.c.bf16 %v944_v10, %v944_v10 }
 0x61b   : > { %2695 = vmatmul.msk.bf16.vlgmr.msrb.gmra.mxu3 %vm734_vm8, %v1038_v54  ;;  %v2721_v54 = vld [vmem:[%s4545_s7 + $0x28] sm:$0xf0] }
 0x61c   : > { %v2724_v55 = vor.u32 %v3118_v52, %v2721_v54 }
 0x61d   : > { %v833_v59 = vpop.permute.xlu1 %832 }
 0x61e   : > { %v838_v61 = vsel %vm764_vm5, %v833_v59, 0  ;;  %1189 = vmatpush.bf16.msrb.mxu1 %v2724_v55  ;;  %v2712_v59 = vor.u32 %v3117_v57, %v2711_v56 }
 0x61f   : > { %847 = vmatpush.bf16.msrb.mxu2 %v838_v61  ;;  %v2716_v61 = vor.u32 %v3116_v58, %v2713_v60 }
 0x622   : > { %2676 = vmatmul.msk.bf16.vlgmr.msrb.gmra.mxu2 %vm734_vm8, %v830_v2  ;;  %v3115_v2 = vld [vmem:[%s4545_s7 + $0x4] sm:$0xf0]  ;;  %1190 = vmatpush.bf16.msrb.mxu1 %v2716_v61 }
 0x623   : > { %961 = vmatpush.bf16.msra.mxu2 %v952_v62  ;;  %v2703_v62 = vld [vmem:[%s4545_s7] sm:$0xf] }
 0x624   : > { %v2704_v4 = vor.u32 %v3115_v2, %v2703_v62 }
 0x626   : > { %1191 = vmatpush.bf16.msrb.mxu1 %v2708_v6 }
 0x627   : > { %1077 = vmatpush.bf16.msrb.mxu2 %v3105_v12 }
 0x632   : > { %2688 = vmatmul.msk.bf16.vlgmr.msra.gmra.mxu2 %vm734_vm8, %v945_v11 }
 0x69e   : > { %v1056_v17 = vpop.f32.mrf.mxu3 }
 0x69f   : > { %v1060_v18 = vpack.c.bf16 %v1056_v17, %v1056_v17 }
 0x6a1   : > { %2700 = vmatmul.msk.bf16.vlgmr.msrb.gmra.mxu2 %vm714_vm6, %v1060_v18 }
 0x6a5   : > { %v849_v19 = vpop.f32.mrf.mxu2 }
 0x6a6   : > { %v853_v23 = vpack.c.bf16 %v849_v19, %v849_v19  ;;  %v1058_v24 = vpop.f32.mrf.mxu3  ;;  %v1109_v19 = vperm.slane %v3963_v46, 2 }
 0x6a8   : > { %2681 = vmatmul.msk.bf16.vlgmr.msrb.gmra.mxu0 %vm714_vm6, %v853_v23 }
 0x6ad   : > { %v851_v25 = vpop.f32.mrf.mxu2 }
 0x6ae   : > { %v1111_v25 = vperm.slane %v3963_v46, 3 }
 0x6b5   : > { %v963_v21 = vpop.f32.mrf.mxu2 }
 0x6b6   : > { %v967_v26 = vpack.c.bf16 %v963_v21, %v963_v21 }
 0x6b8   : > { %2693 = vmatmul.msk.bf16.vlgmr.msra.gmra.mxu0 %vm714_vm6, %v967_v26 }
 0x6bd   : > { %v965_v27 = vpop.f32.mrf.mxu2 }
 0x724   : > { %v1079_v28 = vpop.f32.mrf.mxu2 }
 0x725   : > { %v872_v29 = vpop.f32.mrf.mxu0 }
 0x726   : > { %v895_v32 = vadd.f32 %v4011_v63, %v872_v29  ;;  %v3137_v29 = vld [vmem:[%s4547_s9 + $0x78] sm:$0xff] }
 0x727   : > { %1383 = vmatpush.bf16.msra.mxu2 %v3137_v29 }
 0x72c   : > { %v1081_v30 = vpop.f32.mrf.mxu2 }
 0x72d   : > { %v874_v31 = vpop.f32.mrf.mxu0  ;;  %v3128_v30 = vld [vmem:[%s4547_s9 + $0x30] sm:$0xff] }
 0x72e   : > { %v3136_v31 = vld [vmem:[%s4547_s9 + $0x70] sm:$0xff] }
 0x72f   : > { %1384 = vmatpush.bf16.msra.mxu2 %v3136_v31 }
 0x735   : > { %v986_v33 = vpop.f32.mrf.mxu0 }
 0x736   : > { %v990_v34 = vadd.f32 %v986_v33, %v895_v32  ;;  %v3127_v32 = vld [vmem:[%s4547_s9 + $0x28] sm:$0xff] }
 0x737   : > { %v3135_v33 = vld [vmem:[%s4547_s9 + $0x68] sm:$0xff] }
 0x738   : > { %v1083_v35 = vadd.f32 %v1079_v28, %v990_v34  ;;  %v3129_v28 = vld [vmem:[%s4547_s9 + $0x38] sm:$0xff]  ;;  %1385 = vmatpush.bf16.msra.mxu2 %v3135_v33  ;;  %v3126_v34 = vld [vmem:[%s4547_s9 + $0x20] sm:$0xff] }
 0x739   : > { %1370 = vmatpush.bf16.msra.mxu3 %v3129_v28  ;;  %v1273_v28 = vperm.slane %v3963_v46, 5 }
 0x73a   : > { %v1084_v37 = vadd.f32 %v1083_v35, %v3902_v0  ;;  %v2727_v0 = vld [vmem:[%s4545_s7 + $0x30] sm:$0xf]  ;;  %v3134_v35 = vld [vmem:[%s4547_s9 + $0x60] sm:$0xff] }
 0x73b   : > { %v2728_v47 = vor.u32 %v3121_v44, %v2727_v0 }
 0x73c   : > { %v4036_v38 = vadd.f32 %v1085_v36, %v1084_v37  ;;  %1386 = vmatpush.bf16.msra.mxu2 %v3134_v35  ;;  %v3125_v36 = vld [vmem:[%s4547_s9 + $0x18] sm:$0xff] }
 0x73d   : > { %v988_v39 = vpop.f32.mrf.mxu0  ;;  %1175 = vmatpush.bf16.msrb.mxu0 %v2728_v47  ;;  %1371 = vmatpush.bf16.msra.mxu3 %v3128_v30  ;;  %v3133_v37 = vld [vmem:[%s4547_s9 + $0x58] sm:$0xff] }
 0x73e   : > { %v1087_v40 = vsel %vm590_vm0, %v4036_v38, 0.0  ;;  %v3124_v39 = vld [vmem:[%s4547_s9 + $0x10] sm:$0xff] }
 0x73f   : > { %1088 = vadd.xlane.f32.xlu1 %v1087_v40  ;;  %v3132_v40 = vld [vmem:[%s4547_s9 + $0x50] sm:$0xff] }
 0x740   : > { %1387 = vmatpush.bf16.msra.mxu2 %v3133_v37 }
 0x741   : > { %1176 = vmatpush.bf16.msrb.mxu0 %v2720_v53  ;;  %1372 = vmatpush.bf16.msra.mxu3 %v3127_v32 }
 0x744   : > { %1388 = vmatpush.bf16.msra.mxu2 %v3132_v40 }
 0x745   : > { %1177 = vmatpush.bf16.msrb.mxu0 %v2712_v59  ;;  %1373 = vmatpush.bf16.msra.mxu3 %v3126_v34 }
 0x749   : > { %1178 = vmatpush.bf16.msrb.mxu0 %v2704_v4  ;;  %1374 = vmatpush.bf16.msra.mxu3 %v3125_v36 }
 0x74d   : > { %1375 = vmatpush.bf16.msra.mxu3 %v3124_v39 }
 0x7b2   : > { %v1089_v41 = vpop.xlane.xlu1 %1088 }
 0x7b3   : > { %v1090_v42 = vmul.f32 %v1089_v41, %v3906_v8  ;;  %v1122_v41 = vld [vmem:[#allocation12] sm:$0x3] }
 0x7b5   : > { %v1091_v1 = vsub.f32 %v4036_v38, %v1090_v42  ;;  %v1124_v42 = vperm.slane %v1122_v41, 0 }
 0x7b7   : > { %v1092_v63 = vmul.f32 %v1091_v1, %v1091_v1 }
 0x7b9   : > { %v1093_v43 = vsel %vm590_vm0, %v1092_v63, 0.0  ;;  %v3123_v63 = vld [vmem:[%s4547_s9 + $0x8] sm:$0xff] }
 0x7ba   : > { %1094 = vadd.xlane.f32.xlu2 %v1093_v43  ;;  %v3131_v43 = vld [vmem:[%s4547_s9 + $0x48] sm:$0xff]  ;;  %1376 = vmatpush.bf16.msra.mxu3 %v3123_v63 }
 0x7bb   : > { %1389 = vmatpush.bf16.msra.mxu2 %v3131_v43  ;;  %v2838_v43 = vld [vmem:[%s4542_s4 + $0x78] sm:$0xf0] }
 0x7be   : > { %1377 = vmatpush.bf16.msra.mxu3 %v3122_v48 }
 0x7bf   : > { %1390 = vmatpush.bf16.msra.mxu2 %v3130_v49  ;;  %v2830_v49 = vld [vmem:[%s4542_s4 + $0x68] sm:$0xf0] }
 0x82d   : > { %v1095_v7 = vpop.xlane.xlu2 %1094 }
 0x82e   : > { %v1096_v9 = vmul.f32 %v1095_v7, %v3906_v8 }
 0x830   : > { %v1097_v10 = vadd.f32 1e-05, %v1096_v9 }
 0x832   : > { %3320 = vrsqrt.f32 %v1097_v10  ;;  %vm1104_vm14 = vweird.f32 %v1097_v10 }
 0x838   : > { %v3321_v11 = vpop.eup %3320 }
 0x839   : > { %v1099_v12 = vmul.f32 %v3321_v11, %v1097_v10  ;;  %vm1105_vm13 = vweird.f32 %v3321_v11 }
 0x83a   : > { %vm1106_vm15 = vmor %vm1104_vm14, %vm1105_vm13 }
 0x83b   : > { %v1100_v13 = vmul.f32 %v3321_v11, %v1099_v12 }
 0x83d   : > { %v1101_v15 = vmul.f32 0.5, %v1100_v13 }
 0x83f   : > { %v1102_v17 = vsub.f32 1.5, %v1101_v15 }
 0x841   : > { %v1103_v18 = vmul.f32 %v3321_v11, %v1102_v17 }
 0x843   : > { %v1107_v23 = vsel %vm1106_vm15, %v3321_v11, %v1103_v18 }
 0x844   : > { %v1108_v24 = vmul.f32 %v1107_v23, %v1091_v1  ;;  %v1125_v1 = vperm.slane %v1122_v41, 1 }
 0x846   : > { %v1110_v21 = vmul.f32 %v1109_v19, %v1108_v24 }
 0x848   : > { %v1112_v26 = vadd.f32 %v1111_v25, %v1110_v21 }
 0x84a   : > { %v1113_v27 = vpack.c.bf16 %v1112_v26, %v1112_v26 }
 0x84c   : > { %2733 = vmatmul.msk.bf16.vlgmr.msrb.gmra.mxu0 %vm590_vm0, %v1113_v27  ;;  %2734 = vmatmul.msk.bf16.vlgmr.msrb.gmra.mxu1 %vm590_vm0, %v1113_v27 }
 0x8c9   : > { %v1180_v0 = vpop.f32.mrf.mxu0  ;;  %v1193_v44 = vpop.f32.mrf.mxu1 }
 0x8ca   : > { %v1181_v45 = vadd.f32 %v1180_v0, %v1124_v42  ;;  %v1194_v47 = vadd.f32 %v1193_v44, %v1125_v1  ;;  %v3149_v42 = vld [vmem:[%s4542_s4 + $0x74] sm:$0xf0]  ;;  %v3148_v1 = vld [vmem:[%s4542_s4 + $0x74] sm:$0xf]  ;;  %v2828_v44 = vld [vmem:[%s4542_s4 + $0x60] sm:$0xf] }
 0x8cb   : > { %v2841_v0 = vor.u32 %v3148_v1, %v2838_v43 }
 0x8cc   : > { %v2735_v50 = vmul.f32 -1.702, %v1181_v45  ;;  %v2736_v51 = vmul.f32 -1.702, %v1194_v47 }
 0x8cd   : > { %1511 = vmatpush.bf16.msra.mxu1 %v2841_v0 }
 0x8ce   : > { %v1201_v52 = vmul.f32 1.442695, %v2735_v50  ;;  %v1203_v53 = vmul.f32 1.442695, %v2736_v51  ;;  %v2820_v51 = vld [vmem:[%s4542_s4 + $0x50] sm:$0xf] }
 0x8d0   : > { %3322 = vpow2.f32 %v1201_v52  ;;  %v3145_v52 = vld [vmem:[%s4542_s4 + $0x54] sm:$0xf0] }
 0x8d1   : > { %3324 = vpow2.f32 %v1203_v53  ;;  %v1182_v54 = vpop.f32.mrf.mxu0  ;;  %v1195_v55 = vpop.f32.mrf.mxu1  ;;  %v3144_v53 = vld [vmem:[%s4542_s4 + $0x54] sm:$0xf] }
 0x8d2   : > { %v2821_v54 = vor.u32 %v3145_v52, %v2820_v51  ;;  %v2822_v55 = vld [vmem:[%s4542_s4 + $0x58] sm:$0xf0] }
 0x8d3   : > { %v3138_v51 = vld [vmem:[#allocation10 + $0x20] sm:$0xff] }
 0x8d6   : > { %v3323_v56 = vpop.eup %3322 }
 0x8d7   : > { %v3325_v57 = vpop.eup %3324  ;;  %v1205_v58 = vadd.f32 1.0, %v3323_v56  ;;  %v2825_v56 = vor.u32 %v3144_v53, %v2822_v55 }
 0x8d8   : > { %v1206_v59 = vadd.f32 1.0, %v3325_v57  ;;  %v2812_v57 = vld [vmem:[%s4542_s4 + $0x40] sm:$0xf] }
 0x8d9   : > { %3326 = vrcp.f32 %v1205_v58  ;;  %v1218_v4 = vand.u32 2147483648, %v1205_v58  ;;  %v1216_v7 = vand.u32 2147483647, %v1205_v58  ;;  %vm1212_vm3 = vweird.f32 %v1205_v58 }
 0x8da   : > { %3328 = vrcp.f32 %v1206_v59  ;;  %v1233_v9 = vand.u32 2147483648, %v1206_v59  ;;  %v1231_v11 = vand.u32 2147483647, %v1206_v59  ;;  %vm1227_vm7 = vweird.f32 %v1206_v59 }
 0x8db   : > { %v1219_v13 = vor.u32 1.1754944e-38, %v1218_v4  ;;  %vm1217_vm9 = vcmp.eq.f32.partialorder %v1216_v7, 8.507059e+37 }
 0x8dc   : > { %v1234_v18 = vor.u32 1.1754944e-38, %v1233_v9  ;;  %vm1232_vm11 = vcmp.eq.f32.partialorder %v1231_v11, 8.507059e+37 }
 0x8df   : > { %v3327_v60 = vpop.eup %3326 }
 0x8e0   : > { %v3329_v61 = vpop.eup %3328  ;;  %v1208_v62 = vmul.f32 %v3327_v60, %v1205_v58  ;;  %vm1213_vm1 = vweird.f32 %v3327_v60  ;;  %v3143_v58 = vld [vmem:[%s4542_s4 + $0x44] sm:$0xf0] }
 0x8e1   : > { %v1223_v2 = vmul.f32 %v3329_v61, %v1206_v59  ;;  %vm1228_vm2 = vweird.f32 %v3329_v61  ;;  %vm1214_vm4 = vmor %vm1212_vm3, %vm1213_vm1  ;;  %v3142_v59 = vld [vmem:[%s4542_s4 + $0x44] sm:$0xf] }
 0x8e2   : > { %v1209_v3 = vsub.f32 1.0, %v1208_v62  ;;  %vm1229_vm10 = vmor %vm1227_vm7, %vm1228_vm2 }
 0x8e3   : > { %v1224_v5 = vsub.f32 1.0, %v1223_v2 }
 0x8e4   : > { %v1210_v6 = vmul.f32 %v3327_v60, %v1209_v3 }
 0x8e5   : > { %v1225_v10 = vmul.f32 %v3329_v61, %v1224_v5 }
 0x8e6   : > { %v1211_v12 = vadd.f32 %v3327_v60, %v1210_v6 }
 0x8e7   : > { %v1226_v15 = vadd.f32 %v3329_v61, %v1225_v10  ;;  %v4205_v10 = vld [vmem:[%s4541_s3 + $0x8] sm:$0x3f] }
 0x8e8   : > { %v1215_v17 = vsel %vm1214_vm4, %v3327_v60, %v1211_v12  ;;  %v2813_v60 = vor.u32 %v3143_v58, %v2812_v57 }
 0x8e9   : > { %v1220_v19 = vsel %vm1217_vm9, %v1219_v13, %v1215_v17  ;;  %v1230_v23 = vsel %vm1229_vm10, %v3329_v61, %v1226_v15  ;;  %v2814_v61 = vld [vmem:[%s4542_s4 + $0x48] sm:$0xf0]  ;;  %v1430_v13 = vperm.slane %v4205_v10, 0 }
 0x8ea   : > { %v1237_v24 = vmul.f32 %v1220_v19, %v1181_v45  ;;  %v1235_v25 = vsel %vm1232_vm11, %v1234_v18, %v1230_v23  ;;  %v3147_v45 = vld [vmem:[%s4542_s4 + $0x64] sm:$0xf0]  ;;  %v2817_v62 = vor.u32 %v3142_v59, %v2814_v61  ;;  %v1432_v18 = vperm.slane %v4205_v10, 1 }
 0x8eb   : > { %v1238_v21 = vmul.f32 %v1235_v25, %v1194_v47  ;;  %v3146_v47 = vld [vmem:[%s4542_s4 + $0x64] sm:$0xf]  ;;  %v2829_v48 = vor.u32 %v3147_v45, %v2828_v44  ;;  %v1445_v25 = vld [vmem:[#allocation9 + $0x2] sm:$0x3] }
 0x8ec   : > { %v1239_v26 = vpack.c.bf16 %v1237_v24, %v1237_v24  ;;  %v2833_v50 = vor.u32 %v3146_v47, %v2830_v49 }
 0x8ed   : > { %v1240_v27 = vpack.c.bf16 %v1238_v21, %v1238_v21  ;;  %v1447_v21 = vperm.slane %v1445_v25, 0 }
 0x8ee   : > { %1378 = vmatmul.bf16.vlgmr.msra.gmra.mxu3 %v1239_v26  ;;  %1512 = vmatpush.bf16.msra.mxu1 %v2833_v50  ;;  %v1448_v26 = vperm.slane %v1445_v25, 1 }
 0x8ef   : > { %1391 = vmatmul.bf16.vlgmr.msra.gmra.mxu2 %v1240_v27 }
 0x8f2   : > { %1513 = vmatpush.bf16.msra.mxu1 %v2825_v56 }
 0x8f6   : > { %1514 = vmatpush.bf16.msra.mxu1 %v2817_v62 }
 0x971   : > { %v1379_v29 = vpop.f32.mrf.mxu3 }
 0x972   : > { %v1380_v30 = vadd.f32 %v1379_v29, %v1273_v28  ;;  %v1392_v31 = vpop.f32.mrf.mxu2 }
 0x974   : > { %v1393_v32 = vadd.f32 %v1392_v31, %v1380_v30 }
 0x976   : > { %v4146_v33 = vadd.f32 %v1393_v32, %v4036_v38  ;;  %v2836_v38 = vld [vmem:[%s4542_s4 + $0x70] sm:$0xf] }
 0x977   : > { %v2837_v63 = vor.u32 %v3149_v42, %v2836_v38 }
 0x978   : > { %v1408_v34 = vsel %vm590_vm0, %v4146_v33, 0.0 }
 0x979   : > { %v1381_v35 = vpop.f32.mrf.mxu3  ;;  %1409 = vadd.xlane.f32.xlu0 %v1408_v34  ;;  %1498 = vmatpush.bf16.msra.mxu0 %v2837_v63 }
 0x97a   : > { %v1394_v36 = vpop.f32.mrf.mxu2 }
 0x97d   : > { %1499 = vmatpush.bf16.msra.mxu0 %v2829_v48 }
 0x981   : > { %1500 = vmatpush.bf16.msra.mxu0 %v2821_v54 }
 0x985   : > { %1501 = vmatpush.bf16.msra.mxu0 %v2813_v60 }
 0x9ec   : > { %v1410_v37 = vpop.xlane.xlu0 %1409 }
 0x9ed   : > { %v1411_v39 = vmul.f32 %v1410_v37, %v3906_v8 }
 0x9ef   : > { %v1412_v40 = vsub.f32 %v4146_v33, %v1411_v39 }
 0x9f1   : > { %v1413_v41 = vmul.f32 %v1412_v40, %v1412_v40 }
 0x9f3   : > { %v1414_v46 = vsel %vm590_vm0, %v1413_v41, 0.0 }
 0x9f4   : > { %1415 = vadd.xlane.f32.xlu1 %v1414_v46 }
 0xa67   : > { %v1416_v2 = vpop.xlane.xlu1 %1415 }
 0xa68   : > { %v1417_v3 = vmul.f32 %v1416_v2, %v3906_v8 }
 0xa6a   : > { %v1418_v4 = vadd.f32 1e-05, %v1417_v3 }
 0xa6c   : > { %3330 = vrsqrt.f32 %v1418_v4  ;;  %vm1425_vm13 = vweird.f32 %v1418_v4 }
 0xa72   : > { %v3331_v5 = vpop.eup %3330 }
 0xa73   : > { %v1420_v6 = vmul.f32 %v3331_v5, %v1418_v4  ;;  %vm1426_vm12 = vweird.f32 %v3331_v5 }
 0xa74   : > { %vm1427_vm14 = vmor %vm1425_vm13, %vm1426_vm12 }
 0xa75   : > { %v1421_v7 = vmul.f32 %v3331_v5, %v1420_v6 }
 0xa77   : > { %v1422_v9 = vmul.f32 0.5, %v1421_v7 }
 0xa79   : > { %v1423_v11 = vsub.f32 1.5, %v1422_v9 }
 0xa7b   : > { %v1424_v12 = vmul.f32 %v3331_v5, %v1423_v11 }
 0xa7d   : > { %v1428_v15 = vsel %vm1427_vm14, %v3331_v5, %v1424_v12 }
 0xa7e   : > { %v1429_v17 = vmul.f32 %v1428_v15, %v1412_v40 }
 0xa80   : > { %v1431_v19 = vmul.f32 %v1430_v13, %v1429_v17 }
 0xa82   : > { %v1433_v23 = vadd.f32 %v1432_v18, %v1431_v19 }
 0xa84   : > { %v1434_v24 = vpack.c.bf16 %v1433_v23, %v1433_v23 }
 0xa86   : > { %2842 = vmatmul.msk.bf16.vlgmr.msra.gmra.mxu0 %vm590_vm0, %v1434_v24  ;;  %2843 = vmatmul.msk.bf16.vlgmr.msra.gmra.mxu1 %vm590_vm0, %v1434_v24 }
 0xb03   : > { %v1503_v27 = vpop.f32.mrf.mxu0  ;;  %v1516_v28 = vpop.f32.mrf.mxu1 }
 0xb04   : > { %v1504_v29 = vadd.f32 %v1503_v27, %v1447_v21  ;;  %v1517_v30 = vadd.f32 %v1516_v28, %v1448_v26 }
 0xb06   : > { %v1522_v31 = vpack.c.bf16 %v1504_v29, %v1504_v29  ;;  %v4211_v32 = vpack.c.bf16 %v1517_v30, %v1517_v30  ;;  %v1520_v37 = vmul.f32 0.25, %v1504_v29 }
 0xb08   : > { %1524 = vrot.lane.b32.xlu2 %v1522_v31, %s3648_s13  ;;  %v1575_v34 = vsel %vm764_vm5, %v4211_v32, 0  ;;  %v1521_v39 = vpack.c.bf16 %v1520_v37, %v1520_v37  ;;  %s4582_s13 = sld [smem:[#allocation33_spill]] }
 0xb09   : > { %1584 = vmatpush.bf16.msrb.mxu1 %v1575_v34 }
 0xb0b   : > { %v1505_v35 = vpop.f32.mrf.mxu0  ;;  %v1518_v36 = vpop.f32.mrf.mxu1 }
 0xb0d   : > { %1701 = vmatpush.bf16.msra.mxu1 %v3138_v51 }
 0xb0e   : > { %s3572_s26 = scalar_lea.hbm %s4582_s13, 8 }
 0xb10   : > { %1709 = vrot.lane.b32.xlu2 %v1522_v31, %s3654_s19 }
 0xb18   : > { %1707 = vrot.lane.b32.xlu2 %v1521_v39, %s3655_s25 }
 0xb62   : > { %v1525_v40 = vpop.permute.xlu2 %1524 }
 0xb63   : > { %v1530_v41 = vsel %vm714_vm6, %v1525_v40, 0 }
 0xb64   : > { %1539 = vmatpush.bf16.xpose.msrb.mxu0 %v1530_v41 }
 0xb6a   : > { %v1710_v47 = vpop.permute.xlu2 %1709 }
 0xb6b   : > { %2844 = vmatmul.msk.bf16.vlgmr.msrb.gmra.mxu0 %vm714_vm6, %v1521_v39  ;;  %v1715_v50 = vsel %vm714_vm6, %v1710_v47, 0 }
 0xb72   : > { %v1708_v7 = vpop.permute.xlu2 %1707 }
 0xbe8   : > { %v1541_v46 = vpop.f32.mrf.mxu0 }
 0xbe9   : > { %v1542_v38 = vadd.f32 %v1541_v46, %v3988_v22 }
 0xbeb   : > { %v1545_v42 = vsel %vm734_vm8, %v1542_v38, -inf }
 0xbec   : > { %1546 = vmax.xlane.f32.xlu0 %v1545_v42 }
 0xbf0   : > { %v1543_v1 = vpop.f32.mrf.mxu0 }
 0xc00   : > { %1594 = vrot.lane.b32.xlu0 %v1522_v31, %s3653_s24 }
 0xc08   : > { %1802 = vrot.lane.b32.xlu0 %v1522_v31, %s3650_s15  ;;  %s565_s15 = scalar_lea.vmem [#allocation15], %s2638_s30 }
 0xc5f   : > { %v1547_v63 = vpop.xlane.xlu0 %1546 }
 0xc60   : > { %v1548_v43 = vsub.f32 %v1542_v38, %v1547_v63 }
 0xc62   : > { %v1549_v0 = vmul.f32 1.442695, %v1548_v43 }
 0xc64   : > { %3332 = vpow2.f32 %v1549_v0 }
 0xc6a   : > { %v3333_v44 = vpop.eup %3332 }
 0xc6b   : > { %v1551_v45 = vsel %vm734_vm8, %v3333_v44, 0.0 }
 0xc6c   : > { %1552 = vadd.xlane.f32.xlu1 %v1551_v45 }
 0xc72   : > { %v1595_v48 = vpop.permute.xlu0 %1594 }
 0xc73   : > { %v1600_v49 = vsel %vm714_vm6, %v1595_v48, 0 }
 0xc74   : > { %1609 = vmatpush.bf16.xpose.msrb.mxu3 %v1600_v49 }
 0xc7a   : > { %v1803_v3 = vpop.permute.xlu0 %1802 }
 0xc7b   : > { %v1808_v5 = vsel %vm714_vm6, %v1803_v3, 0 }
 0xc7c   : > { %1724 = vmatpush.bf16.xpose.msra.mxu3 %v1715_v50 }
 0xc85   : > { %1592 = vrot.lane.b32.xlu1 %v1521_v39, %s3649_s16 }
 0xc8d   : > { %1800 = vrot.lane.b32.xlu1 %v1521_v39, %s3651_s20 }
 0xcdf   : > { %v1553_v52 = vpop.xlane.xlu1 %1552 }
 0xce0   : > { %3334 = vrcp.f32 %v1553_v52  ;;  %v1565_v56 = vand.u32 2147483648, %v1553_v52  ;;  %v1563_v58 = vand.u32 2147483647, %v1553_v52  ;;  %vm1559_vm1 = vweird.f32 %v1553_v52 }
 0xce2   : > { %v1566_v60 = vor.u32 1.1754944e-38, %v1565_v56  ;;  %vm1564_vm3 = vcmp.eq.f32.partialorder %v1563_v58, 8.507059e+37 }
 0xce6   : > { %v3335_v53 = vpop.eup %3334 }
 0xce7   : > { %v1555_v54 = vmul.f32 %v3335_v53, %v1553_v52  ;;  %vm1560_vm15 = vweird.f32 %v3335_v53 }
 0xce8   : > { %vm1561_vm2 = vmor %vm1559_vm1, %vm1560_vm15 }
 0xce9   : > { %v1556_v55 = vsub.f32 1.0, %v1555_v54 }
 0xceb   : > { %v1557_v57 = vmul.f32 %v3335_v53, %v1556_v55 }
 0xced   : > { %v1558_v59 = vadd.f32 %v3335_v53, %v1557_v57 }
 0xcef   : > { %v1562_v61 = vsel %vm1561_vm2, %v3335_v53, %v1558_v59 }
 0xcf0   : > { %v1567_v62 = vsel %vm1564_vm3, %v1566_v60, %v1562_v61 }
 0xcf1   : > { %v1568_v2 = vmul.f32 %v3333_v44, %v1567_v62 }
 0xcf3   : > { %v1569_v4 = vpack.c.bf16 %v1568_v2, %v1568_v2 }
 0xcf5   : > { %2845 = vmatmul.msk.bf16.vlgmr.msrb.gmra.mxu1 %vm734_vm8, %v1569_v4 }
 0xcf6   : > { %1817 = vmatpush.bf16.xpose.msrb.mxu1 %v1808_v5 }
 0xcf7   : > { %v1593_v6 = vpop.permute.xlu1 %1592 }
 0xcf8   : > { %2846 = vmatmul.msk.bf16.vlgmr.msrb.gmra.mxu3 %vm714_vm6, %v1593_v6 }
 0xcff   : > { %v1801_v19 = vpop.permute.xlu1 %1800 }
 0xd08   : > { %2858 = vmatmul.msk.bf16.vlgmr.msra.gmra.mxu3 %vm714_vm6, %v1708_v7 }
 0xd72   : > { %v1586_v9 = vpop.f32.mrf.mxu1 }
 0xd73   : > { %v1590_v11 = vpack.c.bf16 %v1586_v9, %v1586_v9 }
 0xd75   : > { %2857 = vmatmul.msk.bf16.vlgmr.msra.gmra.mxu1 %vm714_vm6, %v1590_v11 }
 0xd7a   : > { %v1588_v12 = vpop.f32.mrf.mxu1 }
 0xd7b   : > { %v1611_v13 = vpop.f32.mrf.mxu3 }
 0xd7c   : > { %v1612_v15 = vadd.f32 %v1611_v13, %v3988_v22 }
 0xd7e   : > { %v1615_v17 = vsel %vm734_vm8, %v1612_v15, -inf }
 0xd7f   : > { %1616 = vmax.xlane.f32.xlu0 %v1615_v17 }
 0xd83   : > { %v1613_v18 = vpop.f32.mrf.mxu3 }
 0xd84   : > { %v3139_v18 = vld [vmem:[#allocation10 + $0x28] sm:$0xff] }
 0xd85   : > { %2865 = vmatmul.msk.bf16.vlgmr.msrb.gmra.mxu1 %vm714_vm6, %v1801_v19  ;;  %1679 = vmatpush.bf16.msra.mxu0 %v3139_v18  ;;  %v3152_v18 = vld [vmem:[%s4545_s7 + $0x54] sm:$0xf] }
 0xd8b   : > { %v1726_v23 = vpop.f32.mrf.mxu3 }
 0xd8c   : > { %v1727_v24 = vadd.f32 %v1726_v23, %v3988_v22 }
 0xd8e   : > { %v1730_v25 = vsel %vm734_vm8, %v1727_v24, -inf }
 0xd8f   : > { %1731 = vmax.xlane.f32.xlu1 %v1730_v25 }
 0xd93   : > { %v1728_v21 = vpop.f32.mrf.mxu3 }
 0xd94   : > { %v3140_v21 = vld [vmem:[#allocation10 + $0x30] sm:$0xff] }
 0xd95   : > { %1793 = vmatpush.bf16.msrb.mxu0 %v3140_v21  ;;  %v3151_v21 = vld [vmem:[%s4545_s7 + $0x44] sm:$0xf0] }
 0xdf2   : > { %v4239_v26 = vpop.f32.mrf.mxu1  ;;  %v1617_v27 = vpop.xlane.xlu0 %1616 }
 0xdf3   : > { %v1618_v28 = vsub.f32 %v1612_v15, %v1617_v27 }
 0xdf5   : > { %v1619_v29 = vmul.f32 1.442695, %v1618_v28 }
 0xdf7   : > { %3336 = vpow2.f32 %v1619_v29 }
 0xdfa   : > { %v1705_v30 = vpop.f32.mrf.mxu1 }
 0xdfd   : > { %v3337_v31 = vpop.eup %3336 }
 0xdfe   : > { %v1621_v34 = vsel %vm734_vm8, %v3337_v31, 0.0 }
 0xdff   : > { %1622 = vadd.xlane.f32.xlu0 %v1621_v34 }
 0xe02   : > { %v1732_v35 = vpop.xlane.xlu1 %1731  ;;  %v1819_v36 = vpop.f32.mrf.mxu1 }
 0xe03   : > { %v1733_v37 = vsub.f32 %v1727_v24, %v1732_v35  ;;  %v1820_v39 = vadd.f32 %v1819_v36, %v3988_v22 }
 0xe05   : > { %v1734_v40 = vmul.f32 1.442695, %v1733_v37  ;;  %v1823_v41 = vsel %vm734_vm8, %v1820_v39, -inf }
 0xe06   : > { %1824 = vmax.xlane.f32.xlu2 %v1823_v41 }
 0xe07   : > { %3338 = vpow2.f32 %v1734_v40 }
 0xe0a   : > { %v1821_v46 = vpop.f32.mrf.mxu1 }
 0xe0d   : > { %v3339_v38 = vpop.eup %3338 }
 0xe0e   : > { %v1736_v42 = vsel %vm734_vm8, %v3339_v38, 0.0 }
 0xe0f   : > { %1737 = vadd.xlane.f32.xlu1 %v1736_v42 }
 0xe13   : > { %1641 = vrot.lane.b32.xlu0 %v4211_v32, %s3649_s16  ;;  %s2491_s16 = scalar_lea.hbm %s4582_s13, %s3099_s28 }
 0xe14   : > { %s2495_s24 = sshll.u32 %s2491_s16, 4  ;;  %s2496_s24 = int_to_ptr.hbm [resolvable:$true] %s2495_s24 }
 0xe15   : > { %s3566_s19 = sshra.s32 %s2496_s24, 4  ;;  %s3567_s19 = int_to_ptr.hbm [resolvable:$true] %s3566_s19 }
 0xe16   : > { %p3573_p7 = scmp.lt.s32.totalorder %s3567_s19, %s4582_s13 }
 0xe28   : > { %1755 = vrot.lane.b32.xlu1 %v4211_v32, %s3655_s25  ;;  %s3568_s25 = scalar_lea.hbm %s3567_s19, 4 }
 0xe29   : > { %p3569_p1 = scmp.ne.s32.totalorder %s3567_s19, %s3568_s25  ;;  %p3574_p9 = scmp.lt.s32.totalorder %s3572_s26, %s3568_s25 }
 0xe2b   : > { %p3570_p3 = pnand %p3569_p1, %p3823_p4  ;;  %p3575_p5 = por %p3574_p9, %p3573_p7 }
 0xe2d   : > { %p3571_p12 = pneg %p3570_p3 }
 0xe2f   : > { %p3576_p8 = pnand %p3575_p5, %p3571_p12 }
 0xe72   : > { %v1623_v1 = vpop.xlane.xlu0 %1622 }
 0xe73   : > { %3340 = vrcp.f32 %v1623_v1  ;;  %v1635_v47 = vand.u32 2147483648, %v1623_v1  ;;  %v1633_v49 = vand.u32 2147483647, %v1623_v1  ;;  %vm1629_vm7 = vweird.f32 %v1623_v1 }
 0xe75   : > { %v1636_v51 = vor.u32 1.1754944e-38, %v1635_v47  ;;  %vm1634_vm10 = vcmp.eq.f32.partialorder %v1633_v49, 8.507059e+37 }
 0xe79   : > { %v3341_v63 = vpop.eup %3340  ;;  %v1825_v22 = vpop.xlane.xlu2 %1824 }
 0xe7a   : > { %v1625_v43 = vmul.f32 %v3341_v63, %v1623_v1  ;;  %v1826_v0 = vsub.f32 %v1820_v39, %v1825_v22  ;;  %vm1630_vm4 = vweird.f32 %v3341_v63 }
 0xe7b   : > { %vm1631_vm9 = vmor %vm1629_vm7, %vm1630_vm4 }
 0xe7c   : > { %v1626_v44 = vsub.f32 1.0, %v1625_v43  ;;  %v1827_v45 = vmul.f32 1.442695, %v1826_v0 }
 0xe7e   : > { %v1627_v48 = vmul.f32 %v3341_v63, %v1626_v44  ;;  %3342 = vpow2.f32 %v1827_v45 }
 0xe80   : > { %v1628_v50 = vadd.f32 %v3341_v63, %v1627_v48 }
 0xe82   : > { %v1632_v52 = vsel %vm1631_vm9, %v3341_v63, %v1628_v50  ;;  %v1738_v53 = vpop.xlane.xlu1 %1737  ;;  %v3141_v63 = vld [vmem:[#allocation10 + $0x38] sm:$0xff] }
 0xe83   : > { %v1637_v54 = vsel %vm1634_vm10, %v1636_v51, %v1632_v52  ;;  %3344 = vrcp.f32 %v1738_v53  ;;  %v1750_v5 = vand.u32 2147483648, %v1738_v53  ;;  %vm1744_vm12 = vweird.f32 %v1738_v53 }
 0xe84   : > { %v3343_v55 = vpop.eup %3342  ;;  %v1638_v56 = vmul.f32 %v3337_v31, %v1637_v54  ;;  %v1748_v6 = vand.u32 2147483647, %v1738_v53 }
 0xe85   : > { %v1642_v57 = vpop.permute.xlu0 %1641  ;;  %v1829_v58 = vsel %vm734_vm8, %v3343_v55, 0.0  ;;  %v1751_v9 = vor.u32 1.1754944e-38, %v1750_v5 }
 0xe86   : > { %v1647_v59 = vsel %vm764_vm5, %v1642_v57, 0  ;;  %1830 = vadd.xlane.f32.xlu2 %v1829_v58  ;;  %v1639_v60 = vpack.c.bf16 %v1638_v56, %v1638_v56  ;;  %vm1749_vm14 = vcmp.eq.f32.partialorder %v1748_v6, 8.507059e+37  ;;  %v2898_v6 = vld [vmem:[%s4545_s7 + $0x60] sm:$0xf] }
 0xe87   : > { %1656 = vmatpush.bf16.msrb.mxu2 %v1647_v59 }
 0xe89   : > { %v3345_v61 = vpop.eup %3344 }
 0xe8a   : > { %v1740_v62 = vmul.f32 %v3345_v61, %v1738_v53  ;;  %2847 = vmatmul.msk.bf16.vlgmr.msrb.gmra.mxu2 %vm734_vm8, %v1639_v60  ;;  %vm1745_vm11 = vweird.f32 %v3345_v61  ;;  %v1894_v53 = vperm.slane %v4205_v10, 4 }
 0xe8b   : > { %vm1746_vm13 = vmor %vm1744_vm12, %vm1745_vm11 }
 0xe8c   : > { %v1741_v2 = vsub.f32 1.0, %v1740_v62  ;;  %v3157_v62 = vld [vmem:[%s4545_s7 + $0x74] sm:$0xf0] }
 0xe8e   : > { %v1742_v3 = vmul.f32 %v3345_v61, %v1741_v2  ;;  %v3156_v2 = vld [vmem:[%s4545_s7 + $0x74] sm:$0xf] }
 0xe90   : > { %v1743_v4 = vadd.f32 %v3345_v61, %v1742_v3 }
 0xe92   : > { %v1747_v7 = vsel %vm1746_vm13, %v3345_v61, %v1743_v4  ;;  %v2908_v4 = vld [vmem:[%s4545_s7 + $0x78] sm:$0xf0] }
 0xe93   : > { %v1752_v11 = vsel %vm1749_vm14, %v1751_v9, %v1747_v7  ;;  %v2911_v5 = vor.u32 %v3156_v2, %v2908_v4  ;;  %v3155_v7 = vld [vmem:[%s4545_s7 + $0x64] sm:$0xf0]  ;;  %v3154_v9 = vld [vmem:[%s4545_s7 + $0x64] sm:$0xf] }
 0xe94   : > { %v1753_v12 = vmul.f32 %v3339_v38, %v1752_v11  ;;  %v2899_v11 = vor.u32 %v3155_v7, %v2898_v6  ;;  %v3166_v4 = vld [vmem:[%s4547_s9 + $0xc0] sm:$0xff] }
 0xe95   : > { %1999 = vmatpush.bf16.msra.mxu1 %v2911_v5 }
 0xe96   : > { %v1754_v17 = vpack.c.bf16 %v1753_v12, %v1753_v12  ;;  %v2900_v12 = vld [vmem:[%s4545_s7 + $0x68] sm:$0xf0] }
 0xe9a   : > { %v1756_v13 = vpop.permute.xlu1 %1755 }
 0xe9b   : > { %v1761_v15 = vsel %vm764_vm5, %v1756_v13, 0  ;;  %v2903_v13 = vor.u32 %v3154_v9, %v2900_v12 }
 0xe9c   : > { %1770 = vmatpush.bf16.msra.mxu2 %v1761_v15  ;;  %v2890_v15 = vld [vmem:[%s4545_s7 + $0x50] sm:$0xf] }
 0xe9d   : > { %2000 = vmatpush.bf16.msra.mxu1 %v2903_v13 }
 0xe9e   : > { %1848 = vrot.lane.b32.xlu2 %v4211_v32, %s3651_s20  ;;  %s2493_s20 = sshll.u32 %s565_s15, 4  ;;  %s2494_s20 = int_to_ptr.vmem [resolvable:$true] %s2493_s20 }
 0xe9f   : > { %2859 = vmatmul.msk.bf16.vlgmr.msra.gmra.mxu2 %vm734_vm8, %v1754_v17  ;;  %v3153_v17 = vld [vmem:[%s4545_s7 + $0x54] sm:$0xf0] }
 0xea0   : > { %1886 = vmatpush.bf16.msrb.mxu2 %v3141_v63 }
 0xef9   : > { %v1831_v19 = vpop.xlane.xlu2 %1830 }
 0xefa   : > { %3346 = vrcp.f32 %v1831_v19  ;;  %v1843_v29 = vand.u32 2147483648, %v1831_v19  ;;  %v1841_v31 = vand.u32 2147483647, %v1831_v19  ;;  %vm1837_vm1 = vweird.f32 %v1831_v19 }
 0xefc   : > { %v1844_v34 = vor.u32 1.1754944e-38, %v1843_v29  ;;  %vm1842_vm3 = vcmp.eq.f32.partialorder %v1841_v31, 8.507059e+37  ;;  %v2884_v29 = vld [vmem:[%s4545_s7 + $0x48] sm:$0xf0] }
 0xf00   : > { %v3347_v23 = vpop.eup %3346 }
 0xf01   : > { %v1833_v24 = vmul.f32 %v3347_v23, %v1831_v19  ;;  %v1849_v25 = vpop.permute.xlu2 %1848  ;;  %vm1838_vm15 = vweird.f32 %v3347_v23  ;;  %v2891_v19 = vor.u32 %v3153_v17, %v2890_v15 }
 0xf02   : > { %v1854_v27 = vsel %vm764_vm5, %v1849_v25, 0  ;;  %vm1839_vm2 = vmor %vm1837_vm1, %vm1838_vm15  ;;  %v2882_v25 = vld [vmem:[%s4545_s7 + $0x40] sm:$0xf] }
 0xf03   : > { %v1834_v28 = vsub.f32 1.0, %v1833_v24  ;;  %1863 = vmatpush.bf16.msrb.mxu3 %v1854_v27  ;;  %v3150_v27 = vld [vmem:[%s4545_s7 + $0x44] sm:$0xf] }
 0xf05   : > { %v1835_v30 = vmul.f32 %v3347_v23, %v1834_v28  ;;  %v2883_v28 = vor.u32 %v3151_v21, %v2882_v25 }
 0xf07   : > { %v1836_v32 = vadd.f32 %v3347_v23, %v1835_v30  ;;  %v2887_v30 = vor.u32 %v3150_v27, %v2884_v29 }
 0xf09   : > { %v1840_v35 = vsel %vm1839_vm2, %v3347_v23, %v1836_v32  ;;  %v2892_v23 = vld [vmem:[%s4545_s7 + $0x58] sm:$0xf0] }
 0xf0a   : > { %v1845_v36 = vsel %vm1842_vm3, %v1844_v34, %v1840_v35  ;;  %v2895_v24 = vor.u32 %v3152_v18, %v2892_v23 }
 0xf0b   : > { %v1846_v37 = vmul.f32 %v3343_v55, %v1845_v36 }
 0xf0c   : > { %2001 = vmatpush.bf16.msra.mxu1 %v2895_v24 }
 0xf0d   : > { %v1658_v39 = vpop.f32.mrf.mxu2  ;;  %v1847_v40 = vpack.c.bf16 %v1846_v37, %v1846_v37 }
 0xf0e   : > { %v1662_v41 = vpack.c.bf16 %v1658_v39, %v1658_v39 }
 0xf0f   : > { %2866 = vmatmul.msk.bf16.vlgmr.msrb.gmra.mxu3 %vm734_vm8, %v1847_v40 }
 0xf10   : > { %2852 = vmatmul.msk.bf16.vlgmr.msra.gmra.mxu0 %vm714_vm6, %v1662_v41  ;;  %2002 = vmatpush.bf16.msra.mxu1 %v2887_v30 }
 0xf15   : > { %v1660_v46 = vpop.f32.mrf.mxu2 }
 0xf16   : > { %v1918_v46 = vperm.slane %v4205_v10, 2 }
 0xf22   : > { %v1772_v38 = vpop.f32.mrf.mxu2 }
 0xf23   : > { %v1776_v42 = vpack.c.bf16 %v1772_v38, %v1772_v38 }
 0xf25   : > { %2864 = vmatmul.msk.bf16.vlgmr.msrb.gmra.mxu0 %vm714_vm6, %v1776_v42 }
 0xf2a   : > { %v1774_v1 = vpop.f32.mrf.mxu2 }
 0xf2b   : > { %v1920_v1 = vperm.slane %v4205_v10, 3 }
 0xf8d   : > { %v1681_v22 = vpop.f32.mrf.mxu0 }
 0xf8e   : > { %v1704_v47 = vadd.f32 %v4239_v26, %v1681_v22 }
 0xf92   : > { %v1865_v43 = vpop.f32.mrf.mxu3 }
 0xf93   : > { %v1869_v0 = vpack.c.bf16 %v1865_v43, %v1865_v43 }
 0xf95   : > { %v1683_v44 = vpop.f32.mrf.mxu0  ;;  %2871 = vmatmul.msk.bf16.vlgmr.msrb.gmra.mxu2 %vm714_vm6, %v1869_v0  ;;  %v3165_v0 = vld [vmem:[%s4547_s9 + $0xb8] sm:$0xff] }
 0xf96   : > { %v3173_v44 = vld [vmem:[%s4547_s9 + $0xf8] sm:$0xff]  ;;  %2182 = vmatpush.bf16.msra.mxu3 %v3165_v0  ;;  %v2210_v0 = vstv %s2209_s6 }
 0xf97   : > { %2195 = vmatpush.bf16.msra.mxu2 %v3173_v44  ;;  %vm2211_vm15 = vcmp.eq.s32.totalorder %v3983_v16, %v2210_v0 }
 0xf9a   : > { %v1867_v45 = vpop.f32.mrf.mxu3 }
 0xf9b   : > { %v3164_v45 = vld [vmem:[%s4547_s9 + $0xb0] sm:$0xff] }
 0xf9c   : > { %2183 = vmatpush.bf16.msra.mxu3 %v3164_v45 }
 0xfa2   : > { %v1795_v48 = vpop.f32.mrf.mxu0 }
 0xfa3   : > { %v1799_v49 = vadd.f32 %v1795_v48, %v1704_v47  ;;  %v3172_v47 = vld [vmem:[%s4547_s9 + $0xf0] sm:$0xff]  ;;  %v3163_v48 = vld [vmem:[%s4547_s9 + $0xa8] sm:$0xff] }
 0xfa4   : > { %2196 = vmatpush.bf16.msra.mxu2 %v3172_v47  ;;  %2184 = vmatpush.bf16.msra.mxu3 %v3163_v48 }
 0xfaa   : > { %v1797_v50 = vpop.f32.mrf.mxu0 }
 0xfab   : > { %v3162_v50 = vld [vmem:[%s4547_s9 + $0xa0] sm:$0xff] }
 0xfac   : > { %2185 = vmatpush.bf16.msra.mxu3 %v3162_v50 }
0x1018   : > { %v1888_v51 = vpop.f32.mrf.mxu2 }
0x1019   : > { %v1892_v52 = vadd.f32 %v1888_v51, %v1799_v49  ;;  %v3171_v49 = vld [vmem:[%s4547_s9 + $0xe8] sm:$0xff]  ;;  %v3170_v51 = vld [vmem:[%s4547_s9 + $0xe0] sm:$0xff] }
0x101a   : > { %2197 = vmatpush.bf16.msra.mxu2 %v3171_v49  ;;  %v3012_v49 = vsel %vm2211_vm15, 1.0, %v3652_v20 }
0x101b   : > { %v1893_v54 = vadd.f32 %v1892_v52, %v4146_v33  ;;  %v2906_v33 = vld [vmem:[%s4545_s7 + $0x70] sm:$0xf]  ;;  %v3161_v52 = vld [vmem:[%s4547_s9 + $0x98] sm:$0xff] }
0x101c   : > { %v2907_v3 = vor.u32 %v3157_v62, %v2906_v33  ;;  %2186 = vmatpush.bf16.msra.mxu3 %v3161_v52 }
0x101d   : > { %v4264_v55 = vadd.f32 %v1894_v53, %v1893_v54  ;;  %v3169_v53 = vld [vmem:[%s4547_s9 + $0xd8] sm:$0xff]  ;;  %v3160_v54 = vld [vmem:[%s4547_s9 + $0x90] sm:$0xff] }
0x101e   : > { %1986 = vmatpush.bf16.msra.mxu0 %v2907_v3  ;;  %2198 = vmatpush.bf16.msra.mxu2 %v3170_v51  ;;  %v3158_v3 = vld [vmem:[%s4547_s9 + $0x80] sm:$0xff] }
0x101f   : > { %v1896_v56 = vsel %vm590_vm0, %v4264_v55, 0.0 }
0x1020   : > { %1897 = vadd.xlane.f32.xlu0 %v1896_v56  ;;  %v1890_v57 = vpop.f32.mrf.mxu2  ;;  %v3168_v56 = vld [vmem:[%s4547_s9 + $0xd0] sm:$0xff]  ;;  %2187 = vmatpush.bf16.msra.mxu3 %v3160_v54 }
0x1021   : > { %v1933_v57 = vld [vmem:[#allocation12 + $0x2] sm:$0x3] }
0x1022   : > { %1987 = vmatpush.bf16.msra.mxu0 %v2899_v11  ;;  %2199 = vmatpush.bf16.msra.mxu2 %v3169_v53 }
0x1026   : > { %1988 = vmatpush.bf16.msra.mxu0 %v2891_v19  ;;  %2200 = vmatpush.bf16.msra.mxu2 %v3168_v56 }
0x102a   : > { %1989 = vmatpush.bf16.msra.mxu0 %v2883_v28 }
0x1093   : > { %v1898_v58 = vpop.xlane.xlu0 %1897 }
0x1094   : > { %v1899_v59 = vmul.f32 %v1898_v58, %v3906_v8  ;;  %v1935_v58 = vperm.slane %v1933_v57, 0 }
0x1096   : > { %v1900_v26 = vsub.f32 %v4264_v55, %v1899_v59  ;;  %v1936_v59 = vperm.slane %v1933_v57, 1 }
0x1098   : > { %v1901_v60 = vmul.f32 %v1900_v26, %v1900_v26 }
0x109a   : > { %v1902_v61 = vsel %vm590_vm0, %v1901_v60, 0.0  ;;  %v3167_v60 = vld [vmem:[%s4547_s9 + $0xc8] sm:$0xff] }
0x109b   : > { %1903 = vadd.xlane.f32.xlu2 %v1902_v61  ;;  %2201 = vmatpush.bf16.msra.mxu2 %v3167_v60 }
0x109f   : > { %2202 = vmatpush.bf16.msra.mxu2 %v3166_v4  ;;  %v3174_v4 = vld [vmem:[%s4549_s11] sm:$0xff] }
0x110e   : > { %v1904_v31 = vpop.xlane.xlu2 %1903 }
0x110f   : > { %v1905_v32 = vmul.f32 %v1904_v31, %v3906_v8 }
0x1111   : > { %v1906_v34 = vadd.f32 1e-05, %v1905_v32 }
0x1113   : > { %3348 = vrsqrt.f32 %v1906_v34  ;;  %vm1913_vm6 = vweird.f32 %v1906_v34 }
0x1119   : > { %v3349_v35 = vpop.eup %3348 }
0x111a   : > { %v1908_v36 = vmul.f32 %v3349_v35, %v1906_v34  ;;  %vm1914_vm5 = vweird.f32 %v3349_v35 }
0x111b   : > { %vm1915_vm8 = vmor %vm1913_vm6, %vm1914_vm5  ;;  %vm2470_vm5 = vcmask 1042434   ;;  %vm2472_vm6 = vcmask 1041408  }
0x111c   : > { %v1909_v37 = vmul.f32 %v3349_v35, %v1908_v36 }
0x111e   : > { %v1910_v39 = vmul.f32 0.5, %v1909_v37 }
0x1120   : > { %v1911_v40 = vsub.f32 1.5, %v1910_v39 }
0x1122   : > { %v1912_v41 = vmul.f32 %v3349_v35, %v1911_v40 }
0x1124   : > { %v1916_v38 = vsel %vm1915_vm8, %v3349_v35, %v1912_v41  ;;  %vm2477_vm8 = vcmp.lt.s32.totalorder %v568_v14, 512 }
0x1125   : > { %v1917_v42 = vmul.f32 %v1916_v38, %v1900_v26  ;;  %v3159_v26 = vld [vmem:[%s4547_s9 + $0x88] sm:$0xff] }
0x1126   : > { %2188 = vmatpush.bf16.msra.mxu3 %v3159_v26 }
0x1127   : > { %v1919_v63 = vmul.f32 %v1918_v46, %v1917_v42 }
0x1129   : > { %v1921_v22 = vadd.f32 %v1920_v1, %v1919_v63 }
0x112a   : > { %2189 = vmatpush.bf16.msra.mxu3 %v3158_v3  ;;  %v3175_v3 = vld [vmem:[%s4549_s11 + $0x8] sm:$0xff] }
0x112b   : > { %v1922_v43 = vpack.c.bf16 %v1921_v22, %v1921_v22 }
0x112d   : > { %2912 = vmatmul.msk.bf16.vlgmr.msra.gmra.mxu0 %vm590_vm0, %v1922_v43  ;;  %2913 = vmatmul.msk.bf16.vlgmr.msra.gmra.mxu1 %vm590_vm0, %v1922_v43  ;;  %v2085_v43 = vperm.slane %v4205_v10, 5 }
0x11aa   : > { %v1991_v61 = vpop.f32.mrf.mxu0  ;;  %v2004_v33 = vpop.f32.mrf.mxu1 }
0x11ab   : > { %v1992_v62 = vadd.f32 %v1991_v61, %v1935_v58  ;;  %v2005_v2 = vadd.f32 %v2004_v33, %v1936_v59 }
0x11ad   : > { %v2914_v5 = vmul.f32 -1.702, %v1992_v62  ;;  %v2915_v6 = vmul.f32 -1.702, %v2005_v2 }
0x11af   : > { %v2012_v7 = vmul.f32 1.442695, %v2914_v5  ;;  %v2014_v9 = vmul.f32 1.442695, %v2915_v6  ;;  %v3080_v5 = vld [vmem:[%s4550_s12 + $0x60] sm:$0xf] }
0x11b0   : > { %v3192_v6 = vld [vmem:[%s4550_s12 + $0x6c] sm:$0xf0] }
0x11b1   : > { %3350 = vpow2.f32 %v2012_v7  ;;  %v3190_v7 = vld [vmem:[%s4550_s12 + $0x64] sm:$0xf] }
0x11b2   : > { %3352 = vpow2.f32 %v2014_v9  ;;  %v1993_v11 = vpop.f32.mrf.mxu0  ;;  %v2006_v12 = vpop.f32.mrf.mxu1 }
0x11b3   : > { %v3081_v11 = vor.u32 %v3192_v6, %v3080_v5  ;;  %v3082_v12 = vld [vmem:[%s4550_s12 + $0x70] sm:$0xf0] }
0x11b5   : > { %2413 = vmatpush.bf16.msrb.mxu1 %v3081_v11 }
0x11b7   : > { %v3351_v13 = vpop.eup %3350 }
0x11b8   : > { %v3353_v15 = vpop.eup %3352  ;;  %v2016_v17 = vadd.f32 1.0, %v3351_v13  ;;  %v3191_v13 = vld [vmem:[%s4550_s12 + $0x6c] sm:$0xf] }
0x11b9   : > { %v2017_v18 = vadd.f32 1.0, %v3353_v15  ;;  %v3090_v15 = vld [vmem:[%s4550_s12 + $0x78] sm:$0xf0] }
0x11ba   : > { %3354 = vrcp.f32 %v2016_v17  ;;  %v2029_v27 = vand.u32 2147483648, %v2016_v17  ;;  %v2027_v30 = vand.u32 2147483647, %v2016_v17  ;;  %vm2023_vm9 = vweird.f32 %v2016_v17 }
0x11bb   : > { %3356 = vrcp.f32 %v2017_v18  ;;  %v2044_v31 = vand.u32 2147483648, %v2017_v18  ;;  %v2042_v34 = vand.u32 2147483647, %v2017_v18  ;;  %vm2038_vm11 = vweird.f32 %v2017_v18 }
0x11bc   : > { %v2030_v36 = vor.u32 1.1754944e-38, %v2029_v27  ;;  %vm2028_vm12 = vcmp.eq.f32.partialorder %v2027_v30, 8.507059e+37  ;;  %v3187_v27 = vld [vmem:[%s4550_s12 + $0x4c] sm:$0xf] }
0x11bd   : > { %v2045_v40 = vor.u32 1.1754944e-38, %v2044_v31  ;;  %vm2043_vm14 = vcmp.eq.f32.partialorder %v2042_v34, 8.507059e+37  ;;  %v3184_v34 = vld [vmem:[%s4550_s12 + $0x2c] sm:$0xf0] }
0x11c0   : > { %v3355_v19 = vpop.eup %3354 }
0x11c1   : > { %v3357_v23 = vpop.eup %3356  ;;  %v2019_v24 = vmul.f32 %v3355_v19, %v2016_v17  ;;  %vm2024_vm4 = vweird.f32 %v3355_v19 }
0x11c2   : > { %v2034_v25 = vmul.f32 %v3357_v23, %v2017_v18  ;;  %vm2039_vm7 = vweird.f32 %v3357_v23  ;;  %vm2025_vm10 = vmor %vm2023_vm9, %vm2024_vm4  ;;  %v3085_v18 = vor.u32 %v3190_v7, %v3082_v12 }
0x11c3   : > { %v2020_v21 = vsub.f32 1.0, %v2019_v24  ;;  %vm2040_vm13 = vmor %vm2038_vm11, %vm2039_vm7  ;;  %v3188_v24 = vld [vmem:[%s4550_s12 + $0x4c] sm:$0xf0] }
0x11c4   : > { %v2035_v28 = vsub.f32 1.0, %v2034_v25  ;;  %v3186_v25 = vld [vmem:[%s4550_s12 + $0x44] sm:$0xf] }
0x11c5   : > { %v2021_v29 = vmul.f32 %v3355_v19, %v2020_v21 }
0x11c6   : > { %v2036_v32 = vmul.f32 %v3357_v23, %v2035_v28  ;;  %v3074_v28 = vld [vmem:[%s4550_s12 + $0x58] sm:$0xf0] }
0x11c7   : > { %v2022_v35 = vadd.f32 %v3355_v19, %v2021_v29  ;;  %v3077_v31 = vor.u32 %v3187_v27, %v3074_v28 }
0x11c8   : > { %v2037_v37 = vadd.f32 %v3357_v23, %v2036_v32  ;;  %v3048_v32 = vld [vmem:[%s4550_s12 + $0x20] sm:$0xf] }
0x11c9   : > { %v2026_v39 = vsel %vm2025_vm10, %v3355_v19, %v2022_v35  ;;  %v3093_v19 = vor.u32 %v3191_v13, %v3090_v15  ;;  %v3182_v35 = vld [vmem:[%s4550_s12 + $0x24] sm:$0xf]  ;;  %v2316_v13 = vld [vmem:[%s4581_s5] sm:$0xf] }
0x11ca   : > { %v2031_v41 = vsel %vm2028_vm12, %v2030_v36, %v2026_v39  ;;  %v2041_v46 = vsel %vm2040_vm13, %v3357_v23, %v2037_v37  ;;  %v3064_v23 = vld [vmem:[%s4550_s12 + $0x40] sm:$0xf]  ;;  %v3050_v36 = vld [vmem:[%s4550_s12 + $0x30] sm:$0xf0]  ;;  %v3183_v37 = vld [vmem:[%s4550_s12 + $0x2c] sm:$0xf] }
0x11cb   : > { %v2048_v38 = vmul.f32 %v2031_v41, %v1992_v62  ;;  %v2046_v42 = vsel %vm2043_vm14, %v2045_v40, %v2041_v46  ;;  %v3177_v62 = vld [vmem:[%s4549_s11 + $0x18] sm:$0xff]  ;;  %v3065_v21 = vor.u32 %v3188_v24, %v3064_v23  ;;  %2452 = vmatpush.bf16.msrb.mxu3 %v3093_v19  ;;  %v3049_v40 = vor.u32 %v3184_v34, %v3048_v32 }
0x11cc   : > { %v2049_v1 = vmul.f32 %v2046_v42, %v2005_v2  ;;  %2290 = vmatpush.bf16.msrb.mxu0 %v3177_v62  ;;  %v3176_v2 = vld [vmem:[%s4549_s11 + $0x10] sm:$0xff]  ;;  %v3058_v39 = vld [vmem:[%s4550_s12 + $0x38] sm:$0xf0]  ;;  %v3053_v41 = vor.u32 %v3182_v35, %v3050_v36  ;;  %v3185_v62 = vld [vmem:[%s4550_s12 + $0x34] sm:$0xf0]  ;;  %v2399_v19 = vperm.slane %v2316_v13, 1 }
0x11cd   : > { %v2050_v63 = vpack.c.bf16 %v2048_v38, %v2048_v38  ;;  %2414 = vmatpush.bf16.msrb.mxu1 %v3065_v21  ;;  %v3061_v46 = vor.u32 %v3183_v37, %v3058_v39  ;;  %v2401_v23 = vperm.slane %v2316_v13, 3  ;;  %v2398_v21 = vperm.slane %v2316_v13, 0 }
0x11ce   : > { %v2051_v22 = vpack.c.bf16 %v2049_v1, %v2049_v1 }
0x11cf   : > { %2190 = vmatmul.bf16.vlgmr.msra.gmra.mxu3 %v2050_v63 }
0x11d0   : > { %2203 = vmatmul.bf16.vlgmr.msra.gmra.mxu2 %v2051_v22  ;;  %2291 = vmatpush.bf16.msrb.mxu0 %v3176_v2 }
0x11d1   : > { %2453 = vmatpush.bf16.msrb.mxu3 %v3077_v31  ;;  %2415 = vmatpush.bf16.msrb.mxu1 %v3049_v40 }
0x11d4   : > { %2292 = vmatpush.bf16.msrb.mxu0 %v3175_v3  ;;  %v3040_v3 = vld [vmem:[%s4550_s12 + $0x8] sm:$0xf] }
0x11d5   : > { %2454 = vmatpush.bf16.msrb.mxu3 %v3061_v46 }
0x11d8   : > { %2293 = vmatpush.bf16.msrb.mxu0 %v3174_v4  ;;  %v3181_v4 = vld [vmem:[%s4550_s12 + $0x14] sm:$0xf0] }
0x11d9   : > { %v3041_v5 = vor.u32 %v3181_v4, %v3040_v3 }
0x11dc   : > { %2426 = vmatpush.bf16.msra.mxu0 %v3085_v18 }
0x1252   : > { %v2191_v44 = vpop.f32.mrf.mxu3 }
0x1253   : > { %v2192_v45 = vadd.f32 %v2191_v44, %v2085_v43  ;;  %v2204_v47 = vpop.f32.mrf.mxu2  ;;  %v2222_v43 = vld [vmem:[#allocation13] sm:$0x3] }
0x1255   : > { %v2205_v48 = vadd.f32 %v2204_v47, %v2192_v45  ;;  %v2247_v45 = vrot.slane %v2222_v43, 1 }
0x1257   : > { %v2208_v50 = vadd.f32 %v2205_v48, %v4264_v55 }
0x1259   : > { %v2214_v51 = vmul.f32 %v3012_v49, %v2208_v50 }
0x125a   : > { %v2193_v52 = vpop.f32.mrf.mxu3 }
0x125b   : > { %v2215_v53 = vsel %vm590_vm0, %v2214_v51, 0.0  ;;  %v2206_v54 = vpop.f32.mrf.mxu2  ;;  %v3032_v51 = vld [vmem:[%s4550_s12] sm:$0xf]  ;;  %v3180_v52 = vld [vmem:[%s4550_s12 + $0xc] sm:$0xf0] }
0x125c   : > { %v2216_v56 = vrot.slane %v2215_v53, 4  ;;  %v3033_v54 = vor.u32 %v3180_v52, %v3032_v51 }
0x125e   : > { %v2217_v57 = vadd.f32 %v2216_v56, %v2215_v53  ;;  %v3178_v53 = vld [vmem:[%s4550_s12 + $0x4] sm:$0xf]  ;;  %v3034_v56 = vld [vmem:[%s4550_s12 + $0x10] sm:$0xf0]  ;;  %2416 = vmatpush.bf16.msrb.mxu1 %v3033_v54 }
0x1260   : > { %v2218_v58 = vrot.slane %v2217_v57, 2 }
0x1262   : > { %v2219_v10 = vadd.f32 %v2218_v58, %v2217_v57  ;;  %v3179_v57 = vld [vmem:[%s4550_s12 + $0xc] sm:$0xf]  ;;  %v3042_v58 = vld [vmem:[%s4550_s12 + $0x18] sm:$0xf0] }
0x1264   : > { %v2220_v59 = vrot.slane %v2219_v10, 1 }
0x1266   : > { %v2221_v26 = vadd.f32 %v2220_v59, %v2219_v10  ;;  %v3037_v10 = vor.u32 %v3178_v53, %v3034_v56  ;;  %v3045_v59 = vor.u32 %v3179_v57, %v3042_v58 }
0x1268   : > { %v2223_v60 = vsel %vm590_vm0, %v2221_v26, 0.0  ;;  %2455 = vmatpush.bf16.msrb.mxu3 %v3045_v59 }
0x1269   : > { %2224 = vadd.xlane.f32.xlu1 %v2223_v60  ;;  %v3193_v60 = vld [vmem:[%s4550_s12 + $0x74] sm:$0xf0] }
0x12dc   : > { %v2225_v16 = vpop.xlane.xlu1 %2224 }
0x12dd   : > { %v2226_v61 = vmul.f32 %v2225_v16, %v3906_v8 }
0x12df   : > { %v4380_v20 = vsub.f32 %v2221_v26, %v2226_v61  ;;  %v3088_v26 = vld [vmem:[%s4550_s12 + $0x68] sm:$0xf] }
0x12e0   : > { %v3089_v16 = vor.u32 %v3193_v60, %v3088_v26  ;;  %v3072_v61 = vld [vmem:[%s4550_s12 + $0x48] sm:$0xf] }
0x12e1   : > { %v2228_v55 = vmul.f32 %v4380_v20, %v4380_v20 }
0x12e2   : > { %2439 = vmatpush.bf16.msra.mxu1 %v3089_v16 }
0x12e3   : > { %v2229_v33 = vsel %vm590_vm0, %v2228_v55, 0.0 }
0x12e4   : > { %2230 = vadd.xlane.f32.xlu0 %v2229_v33  ;;  %v3056_v33 = vld [vmem:[%s4550_s12 + $0x28] sm:$0xf] }
0x12e5   : > { %v3057_v2 = vor.u32 %v3185_v62, %v3056_v33 }
0x1357   : > { %v2231_v9 = vpop.xlane.xlu0 %2230 }
0x1358   : > { %v2232_v17 = vmul.f32 %v2231_v9, %v3906_v8  ;;  %v3066_v8 = vld [vmem:[%s4550_s12 + $0x50] sm:$0xf0] }
0x1359   : > { %v3069_v30 = vor.u32 %v3186_v25, %v3066_v8  ;;  %v2400_v25 = vperm.slane %v2316_v13, 2 }
0x135a   : > { %v2233_v29 = vadd.f32 1e-05, %v2232_v17 }
0x135b   : > { %2427 = vmatpush.bf16.msra.mxu0 %v3069_v30 }
0x135c   : > { %3358 = vrsqrt.f32 %v2233_v29  ;;  %vm2240_vm2 = vweird.f32 %v2233_v29 }
0x135f   : > { %2428 = vmatpush.bf16.msra.mxu0 %v3053_v41 }
0x1362   : > { %v3359_v38 = vpop.eup %3358 }
0x1363   : > { %v2235_v42 = vmul.f32 %v3359_v38, %v2233_v29  ;;  %vm2241_vm1 = vweird.f32 %v3359_v38  ;;  %2429 = vmatpush.bf16.msra.mxu0 %v3037_v10 }
0x1364   : > { %vm2242_vm3 = vmor %vm2240_vm2, %vm2241_vm1 }
0x1365   : > { %v2236_v1 = vmul.f32 %v3359_v38, %v2235_v42 }
0x1367   : > { %v2237_v63 = vmul.f32 0.5, %v2236_v1 }
0x1369   : > { %v2238_v22 = vsub.f32 1.5, %v2237_v63 }
0x136b   : > { %v2239_v0 = vmul.f32 %v3359_v38, %v2238_v22 }
0x136d   : > { %v2243_v44 = vsel %vm2242_vm3, %v3359_v38, %v2239_v0 }
0x136e   : > { %v2244_v47 = vmul.f32 %v2243_v44, %v4380_v20  ;;  %v3189_v20 = vld [vmem:[%s4550_s12 + $0x54] sm:$0xf0] }
0x136f   : > { %v3073_v55 = vor.u32 %v3189_v20, %v3072_v61 }
0x1370   : > { %v2245_v48 = vmul.f32 %v2244_v47, %v2222_v43 }
0x1371   : > { %2440 = vmatpush.bf16.msra.mxu1 %v3073_v55 }
0x1372   : > { %v2249_v49 = vadd.f32 %v2247_v45, %v2245_v48 }
0x1374   : > { %v2250_v50 = vpack.c.bf16 %v2249_v49, %v2249_v49 }
0x1375   : > { %2441 = vmatpush.bf16.msra.mxu1 %v3057_v2 }
0x1376   : > { %3029 = vmatmul.msk.bf16.vlgmr.msrb.gmra.mxu0 %vm590_vm0, %v2250_v50 }
0x1379   : > { %2442 = vmatpush.bf16.msra.mxu1 %v3041_v5 }
0x13f3   : > { %v2295_v6 = vpop.f32.mrf.mxu0 }
0x13f4   : > { %v2299_v7 = vpack.c.bf16 %v2295_v6, %v2295_v6 }
0x13f6   : > { %3094 = vmatmul.msk.bf16.vlgmr.msrb.gmra.mxu1 %vm590_vm0, %v2299_v7  ;;  %3095 = vmatmul.msk.bf16.vlgmr.msra.gmra.mxu0 %vm590_vm0, %v2299_v7 }
0x13f7   : > { %3097 = vmatmul.msk.bf16.vlgmr.msrb.gmra.mxu3 %vm590_vm0, %v2299_v7 }
0x13fb   : > { %v2297_v9 = vpop.f32.mrf.mxu0 }
0x1406   : > { %3096 = vmatmul.msk.bf16.vlgmr.msra.gmra.mxu1 %vm590_vm0, %v2299_v7  ;;  %vm2468_vm0 = vcmask 1040384  }
0x1473   : > { %v2418_v11 = vpop.f32.mrf.mxu1  ;;  %v2431_v12 = vpop.f32.mrf.mxu0 }
0x1474   : > { %v2432_v24 = vadd.f32 %v2431_v12, %v2399_v19  ;;  %v2419_v31 = vadd.f32 %v2418_v11, %v2398_v21 }
0x1476   : > { %v2465_v29 = vrot.slane %v2432_v24, 7 }
0x1478   : > { %v2469_v35 = vsel %vm2468_vm0, %v2419_v31, %v2465_v29 }
0x147a   : > { %v2457_v15 = vpop.f32.mrf.mxu3 }
0x147b   : > { %v2420_v17 = vpop.f32.mrf.mxu1  ;;  %v2433_v18 = vpop.f32.mrf.mxu0  ;;  %v2458_v8 = vadd.f32 %v2457_v15, %v2401_v23 }
0x147d   : > { %v2467_v32 = vrot.slane %v2458_v8, 5 }
0x1482   : > { %v2459_v27 = vpop.f32.mrf.mxu3 }
0x1483   : > { %v2444_v28 = vpop.f32.mrf.mxu1 }
0x1484   : > { %v2445_v30 = vadd.f32 %v2444_v28, %v2400_v25 }
0x1486   : > { %v2466_v34 = vrot.slane %v2445_v30, 6 }
0x1488   : > { %v2471_v36 = vsel %vm2470_vm5, %v2466_v34, %v2467_v32 }
0x1489   : > { %v2473_v37 = vsel %vm2472_vm6, %v2469_v35, %v2471_v36 }
0x148a   : > { %2479 = vst.msk [vmem:[%s565_s15] sm:$0xf] %vm2477_vm8, %v2473_v37 }
0x148b   : > { %v2446_v39 = vpop.f32.mrf.mxu1 }
0x148c   : > { %3579 = shalt.err (!%p3576_p8)
}
0x148d   : > { %3214 = dma.vmem_to_hbm [thread:$0]  (%p3823_p4), %s2494_s20, 64, %s2496_s24, %s2481_s23  }
0x148e PF: > { %s4583_s10 = sld [smem:[#allocation23_spill]]  ;;  %p4585_p10 = scmp.ge.s32.totalorder %s3636_s0, 2 }
0x1490   : > { %p3237_p13 = pnand %p4585_p10, %p3827_p6 }
0x1492   : > { %p3238_p11 = pneg %p3237_p13 }
0x1494   : > { %s2507_s5 = sand.u32 1, %s4583_s10  }
0x1495   : > { %s2508_s30 = scalar_lea.sflag [#allocation6], %s2507_s5 }
0x1496   : > { %3619 = dma.done.wait (%p3238_p11), %s2508_s30, 64  }
0x1497   : > { %3621 = vsyncadd (%p3238_p11), %s2508_s30, 4294967232  ;;  %s4586_s0 = sld [smem:[#allocation25_spill]]  ;;  %s4589_s17 = smov %s3628_s18 }
0x1498   : > { %s4587_s28 = sld [smem:[#allocation24_spill]] }
0x1499   : > { %s4588_s19 = sld [smem:[#allocation26_spill]] }
0x149d   : > { %p40_p0 = scmp.ge.s32.totalorder %s4586_s0, 4  }
0x149e   : > { %s4590_s18 = smov %s4587_s28 }
0x149f   :  { %42 = sbr.rel (!%p40_p0) target bundleno = 20 (0x14), region = 153 }
0x14a4   :  { %2514 = vsyncpa [#allocation5], 1 }
0x14a5   :  { %2516 = vsyncpa [#allocation5 + $0x1], 1 }
0x14a6   :  { %2517 = vsyncpa [#allocation8], 1 }
0x14a7   :  { %2519 = vsyncpa [#allocation8 + $0x1], 1 }
0x14a8   :  { %2520 = vsyncpa [#allocation11], 1 }
0x14a9   :  { %2521 = vsyncpa [#allocation14], 1 }
0x14aa   :  { %2522 = vsyncpa [#allocation6], 1 }
0x14ab   :  { %2524 = vsyncpa [#allocation6 + $0x1], 1 }

</bundles_post_ra>
